<compile_context>
chip_gen: v5e
topology: v5e:2x2
jax: 0.10.0
libtpu: 0.0.40
codegen_flags: <defaults>
</compile_context>

<pallas_src>
import math
import jax
import jax.numpy as jnp
from jax.experimental import pallas as pl
from jax.experimental.pallas import tpu as pltpu

# ---------------- problem sizes (small, consistent with the module) -------------
BATCH = 2
SEQ = 8
HIDDEN = 32
NUM_HEADS = 4
HEAD_DIM = HIDDEN // NUM_HEADS
FF_DIM = 64
EPS = 1e-6


def _layernorm(v, gamma, beta):
    # PyTorch: std(-1) is unbiased (ddof=1); formula gamma*(x-mean)/(std+eps)+beta
    mean = jnp.mean(v, axis=-1, keepdims=True)
    var = jnp.sum((v - mean) ** 2, axis=-1, keepdims=True) / (v.shape[-1] - 1)
    std = jnp.sqrt(var)
    inv = pl.reciprocal(std + EPS, approx=False)          # EUP instead of VALU divide
    return gamma * (v - mean) * inv + beta


def _gelu(v):
    c = math.sqrt(2.0 / math.pi)
    return 0.5 * v * (1.0 + jnp.tanh(c * (v + 0.044715 * v * v * v)))


def _make_kernel(nb):
    """Build a kernel that processes `nb` batch elements (nb*SEQ rows) per grid step."""
    S, D, H, Hd = SEQ, HIDDEN, NUM_HEADS, HEAD_DIM
    inv_scale = 1.0 / math.sqrt(Hd)

    def kernel(
        x_ref,
        wqkv_ref, bqkv_ref, wo_ref, bo_ref,
        w1_ref, b1_ref, w2_ref, b2_ref,
        g1_ref, be1_ref, g2_ref, be2_ref,
        out_ref, attn_ref,
    ):
        x = x_ref[...].astype(jnp.float32)                  # (nb*S, D)

        # ---- fused Q|K|V projection: one MXU push (K=32, N=96) ----
        qkv = jnp.dot(x, wqkv_ref[...], preferred_element_type=jnp.float32)
        qkv = qkv + bqkv_ref[...]                            # (nb*S, 3D)

        wo = wo_ref[...]                                     # (D, D)

        attn_out_rows = []
        for b in range(nb):                                  # static loop
            r0 = b * S
            head_attn = []
            ctx = None
            for h in range(H):                               # static loop
                cq = h * Hd
                ck = D + h * Hd
                cv = 2 * D + h * Hd
                qh = qkv[r0:r0 + S, cq:cq + Hd]              # (S, Hd)
                kh = qkv[r0:r0 + S, ck:ck + Hd]
                vh = qkv[r0:r0 + S, cv:cv + Hd]

                energy = jnp.dot(qh, kh.T, preferred_element_type=jnp.float32) * inv_scale
                energy = energy - jnp.max(energy, axis=-1, keepdims=True)
                e = jnp.exp(energy)
                p = e * pl.reciprocal(jnp.sum(e, axis=-1, keepdims=True), approx=False)
                head_attn.append(p)                          # (S, S)

                # Accumulate the output projection per head:
                #   concat_h(p_h @ v_h) @ Wo  ==  sum_h (p_h @ v_h) @ Wo[h*Hd:(h+1)*Hd, :]
                # -> no cross-lane concatenate of the per-head context.
                oh = jnp.dot(p, vh, preferred_element_type=jnp.float32)             # (S, Hd)
                part = jnp.dot(oh, wo[cq:cq + Hd, :], preferred_element_type=jnp.float32)
                ctx = part if ctx is None else ctx + part

            attn_out_rows.append(ctx)                        # (S, D)
            # One wide (S, H*S) store per batch element, after the head loop,
            # instead of H tiny masked (S, S) stores inside it.
            attn_ref[b] = jnp.concatenate(head_attn, axis=-1).astype(attn_ref.dtype)

        attn_out = attn_out_rows[0] if nb == 1 else jnp.concatenate(attn_out_rows, axis=0)
        attn_out = attn_out + bo_ref[...]                    # (nb*S, D)

        # ---- residual + LayerNorm 1 ----
        x1 = _layernorm(x + attn_out, g1_ref[...], be1_ref[...])

        # ---- position-wise feed-forward ----
        h1 = jnp.dot(x1, w1_ref[...], preferred_element_type=jnp.float32) + b1_ref[...]
        h1 = _gelu(h1)
        ff = jnp.dot(h1, w2_ref[...], preferred_element_type=jnp.float32) + b2_ref[...]

        # ---- residual + LayerNorm 2 ----
        x2 = _layernorm(x1 + ff, g2_ref[...], be2_ref[...])

        out_ref[...] = x2.astype(out_ref.dtype)              # single (nb*S, D) store

    return kernel


def _rows_per_step(batch):
    """Single-TC chips (v5e/v6e): collapse the grid. Multi-TC chips: 1 batch/core."""
    try:
        kind = jax.devices()[0].device_kind.lower()
    except Exception:  # pragma: no cover - conservative fallback
        kind = ""
    multi_tc = any(tag in kind for tag in ("v7", "v4", "v5p"))
    return 1 if (multi_tc and batch > 1) else batch


def transformer_block(x, params):
    """x: (B, S, D) float32. params: dict of weights (already (in,out) layout)."""
    B, S, D = x.shape
    H = NUM_HEADS

    # Fold batch into the row dimension for all dense matmuls.
    x2d = x.reshape(B * S, D).astype(jnp.float32)

    # Fuse Q/K/V weights and biases (done once, outside the kernel).
    wqkv = jnp.concatenate([params["wq"], params["wk"], params["wv"]], axis=1)  # (D, 3D)
    bqkv = jnp.concatenate([params["bq"], params["bk"], params["bv"]], axis=1)  # (1, 3D)

    nb = _rows_per_step(B)          # batch elements per grid step
    grid = (B // nb,)

    weight_args = [
        wqkv, bqkv, params["wo"], params["bo"],
        params["w1"], params["b1"], params["w2"], params["b2"],
        params["g1"], params["be1"], params["g2"], params["be2"],
    ]

    def full_spec(shape):
        nd = len(shape)
        return pl.BlockSpec(shape, lambda i, _nd=nd: (0,) * _nd)

    in_specs = [pl.BlockSpec((nb * S, D), lambda i: (i, 0))]
    in_specs += [full_spec(w.shape) for w in weight_args]

    out_shapes = (
        jax.ShapeDtypeStruct((B * S, D), jnp.float32),       # output, (rows, D)
        jax.ShapeDtypeStruct((B, S, H * S), jnp.float32),    # attention, heads packed on lanes
    )
    out_specs = (
        pl.BlockSpec((nb * S, D), lambda i: (i, 0)),
        pl.BlockSpec((nb, S, H * S), lambda i: (i, 0, 0)),
    )

    fn = pl.pallas_call(
        _make_kernel(nb),
        out_shape=out_shapes,
        grid_spec=pltpu.PrefetchScalarGridSpec(
            num_scalar_prefetch=0,
            grid=grid,
            in_specs=in_specs,
            out_specs=out_specs,
        ),
        compiler_params=pltpu.CompilerParams(
            dimension_semantics=("parallel",),
        ),
    )
    out2d, attn3d = fn(x2d, *weight_args)

    # Layout plumbing outside the kernel (cheap XLA reshapes/transposes).
    out = out2d.reshape(B, S, D)
    attn = attn3d.reshape(B, S, H, S).transpose(0, 2, 1, 3)  # -> (B, H, S, S)
    return out, attn


def init_params(key):
    """Deterministic synthetic parameter init (shapes match the PyTorch module)."""
    ks = jax.random.split(key, 12)

    def lin(kw, kb, fan_in, fan_out):
        # nn.Linear weight is (out,in); we store the transpose (in,out) for x @ W.
        w = jax.random.normal(kw, (fan_in, fan_out), jnp.float32) * 0.05
        b = jax.random.normal(kb, (1, fan_out), jnp.float32) * 0.05
        return w, b

    wq, bq = lin(ks[0], ks[1], HIDDEN, HIDDEN)
    wk, bk = lin(ks[2], ks[3], HIDDEN, HIDDEN)
    wv, bv = lin(ks[4], ks[5], HIDDEN, HIDDEN)
    wo, bo = lin(ks[6], ks[7], HIDDEN, HIDDEN)
    w1, b1 = lin(ks[8], ks[9], HIDDEN, FF_DIM)
    w2, b2 = lin(ks[10], ks[11], FF_DIM, HIDDEN)

    return {
        "wq": wq, "bq": bq, "wk": wk, "bk": bk, "wv": wv, "bv": bv,
        "wo": wo, "bo": bo, "w1": w1, "b1": b1, "w2": w2, "b2": b2,
        # LayerNorm params: gamma = ones, beta = zeros (as in the module init)
        "g1": jnp.ones((1, HIDDEN), jnp.float32),
        "be1": jnp.zeros((1, HIDDEN), jnp.float32),
        "g2": jnp.ones((1, HIDDEN), jnp.float32),
        "be2": jnp.zeros((1, HIDDEN), jnp.float32),
    }


def reference_jax(x, p):
    """Pure-JAX reference mirroring the PyTorch forward (eval mode)."""
    B, S, D = x.shape
    q = x @ p["wq"] + p["bq"]
    k = x @ p["wk"] + p["bk"]
    v = x @ p["wv"] + p["bv"]

    def split_heads(t):
        return t.reshape(B, S, NUM_HEADS, HEAD_DIM).transpose(0, 2, 1, 3)

    qh, kh, vh = split_heads(q), split_heads(k), split_heads(v)
    energy = jnp.einsum("bhqd,bhkd->bhqk", qh, kh) / math.sqrt(HEAD_DIM)
    attn = jax.nn.softmax(energy, axis=-1)
    out = jnp.einsum("bhqk,bhkd->bhqd", attn, vh)
    out = out.transpose(0, 2, 1, 3).reshape(B, S, D)
    out = out @ p["wo"] + p["bo"]

    def ln(t, g, b):
        mean = t.mean(-1, keepdims=True)
        std = jnp.sqrt(((t - mean) ** 2).sum(-1, keepdims=True) / (t.shape[-1] - 1))
        return g * (t - mean) / (std + EPS) + b

    def gelu(v_):
        c = math.sqrt(2.0 / math.pi)
        return 0.5 * v_ * (1.0 + jnp.tanh(c * (v_ + 0.044715 * v_ * v_ * v_)))

    x1 = ln(x + out, p["g1"], p["be1"])
    h1 = gelu(x1 @ p["w1"] + p["b1"])
    ff = h1 @ p["w2"] + p["b2"]
    x2 = ln(x1 + ff, p["g2"], p["be2"])
    return x2, attn


if __name__ == "__main__":
    key = jax.random.PRNGKey(0)
    kx, kp = jax.random.split(key)
    x = jax.random.normal(kx, (BATCH, SEQ, HIDDEN), jnp.float32)
    params = init_params(kp)

    out, attn = transformer_block(x, params)
    out = jax.block_until_ready(out)
    attn = jax.block_until_ready(attn)

    # sanity check against pure-JAX reference
    ref_out, ref_attn = reference_jax(x, params)
    assert out.shape == (BATCH, SEQ, HIDDEN)
    assert attn.shape == (BATCH, NUM_HEADS, SEQ, SEQ)
    assert jnp.allclose(out, ref_out, atol=1e-4, rtol=1e-4), "output mismatch"
    assert jnp.allclose(attn, ref_attn, atol=1e-5, rtol=1e-4), "attention mismatch"

    print("KERNEL_OK")
</pallas_src>

<mosaic_0001>
module attributes {stable_mosaic.version = 11 : i64} {
  func.func @kernel(%arg0: i32, %arg1: memref<16x32xf32, #tpu.memory_space<vmem>>, %arg2: memref<32x96xf32, #tpu.memory_space<vmem>>, %arg3: memref<1x96xf32, #tpu.memory_space<vmem>>, %arg4: memref<32x32xf32, #tpu.memory_space<vmem>>, %arg5: memref<1x32xf32, #tpu.memory_space<vmem>>, %arg6: memref<32x64xf32, #tpu.memory_space<vmem>>, %arg7: memref<1x64xf32, #tpu.memory_space<vmem>>, %arg8: memref<64x32xf32, #tpu.memory_space<vmem>>, %arg9: memref<1x32xf32, #tpu.memory_space<vmem>>, %arg10: memref<1x32xf32, #tpu.memory_space<vmem>>, %arg11: memref<1x32xf32, #tpu.memory_space<vmem>>, %arg12: memref<1x32xf32, #tpu.memory_space<vmem>>, %arg13: memref<1x32xf32, #tpu.memory_space<vmem>>, %arg14: memref<16x32xf32, #tpu.memory_space<vmem>>, %arg15: memref<2x8x32xf32, #tpu.memory_space<vmem>>) attributes {dimension_semantics = [#tpu.dimension_semantics<parallel>], iteration_bounds = array<i64: 1>, scalar_prefetch = 0 : i64, scratch_operands = 0 : i64, tpu.core_type = #tpu.core_type<tc>, window_params = [{transform_indices = @transform_0, window_bounds = array<i64: 16, 32>}, {pipeline_mode = #tpu.pipeline_mode<synchronous>, transform_indices = @transform_1, window_bounds = array<i64: 32, 96>}, {pipeline_mode = #tpu.pipeline_mode<synchronous>, transform_indices = @transform_2, window_bounds = array<i64: 1, 96>}, {pipeline_mode = #tpu.pipeline_mode<synchronous>, transform_indices = @transform_3, window_bounds = array<i64: 32, 32>}, {pipeline_mode = #tpu.pipeline_mode<synchronous>, transform_indices = @transform_4, window_bounds = array<i64: 1, 32>}, {pipeline_mode = #tpu.pipeline_mode<synchronous>, transform_indices = @transform_5, window_bounds = array<i64: 32, 64>}, {pipeline_mode = #tpu.pipeline_mode<synchronous>, transform_indices = @transform_6, window_bounds = array<i64: 1, 64>}, {pipeline_mode = #tpu.pipeline_mode<synchronous>, transform_indices = @transform_7, window_bounds = array<i64: 64, 32>}, {pipeline_mode = #tpu.pipeline_mode<synchronous>, transform_indices = @transform_8, window_bounds = array<i64: 1, 32>}, {pipeline_mode = #tpu.pipeline_mode<synchronous>, transform_indices = @transform_9, window_bounds = array<i64: 1, 32>}, {pipeline_mode = #tpu.pipeline_mode<synchronous>, transform_indices = @transform_10, window_bounds = array<i64: 1, 32>}, {pipeline_mode = #tpu.pipeline_mode<synchronous>, transform_indices = @transform_11, window_bounds = array<i64: 1, 32>}, {pipeline_mode = #tpu.pipeline_mode<synchronous>, transform_indices = @transform_12, window_bounds = array<i64: 1, 32>}, {transform_indices = @transform_13, window_bounds = array<i64: 16, 32>}, {transform_indices = @transform_14, window_bounds = array<i64: 2, 8, 32>}]} {
    %c0 = arith.constant 0 : index
    %c0_0 = arith.constant 0 : index
    %0 = vector.load %arg1[%c0, %c0_0] : memref<16x32xf32, #tpu.memory_space<vmem>>, vector<16x32xf32>
    %c0_1 = arith.constant 0 : index
    %c0_2 = arith.constant 0 : index
    %1 = vector.load %arg2[%c0_1, %c0_2] : memref<32x96xf32, #tpu.memory_space<vmem>>, vector<32x96xf32>
    %cst = arith.constant dense<0.000000e+00> : vector<16x96xf32>
    %2 = tpu.matmul %0, %1, %cst {dimension_numbers = #tpu.dot_dimension_numbers<[1], [0], [0], [1], [0, 0, 1, 1], [], []>} : vector<16x32xf32>, vector<32x96xf32>, vector<16x96xf32> -> vector<16x96xf32>
    %c0_3 = arith.constant 0 : index
    %c0_4 = arith.constant 0 : index
    %3 = vector.load %arg3[%c0_3, %c0_4] : memref<1x96xf32, #tpu.memory_space<vmem>>, vector<1x96xf32>
    %4 = vector.broadcast %3 : vector<1x96xf32> to vector<16x96xf32>
    %5 = arith.addf %2, %4 : vector<16x96xf32>
    %c0_5 = arith.constant 0 : index
    %c0_6 = arith.constant 0 : index
    %6 = vector.load %arg4[%c0_5, %c0_6] : memref<32x32xf32, #tpu.memory_space<vmem>>, vector<32x32xf32>
    %7 = vector.extract_strided_slice %5 {offsets = [0, 0], sizes = [8, 8], strides = [1, 1]} : vector<16x96xf32> to vector<8x8xf32>
    %8 = vector.extract_strided_slice %5 {offsets = [0, 32], sizes = [8, 8], strides = [1, 1]} : vector<16x96xf32> to vector<8x8xf32>
    %9 = vector.extract_strided_slice %5 {offsets = [0, 64], sizes = [8, 8], strides = [1, 1]} : vector<16x96xf32> to vector<8x8xf32>
    %10 = tpu.transpose %8, [1, 0] : vector<8x8xf32> -> vector<8x8xf32>
    %cst_7 = arith.constant dense<0.000000e+00> : vector<8x8xf32>
    %11 = tpu.matmul %7, %10, %cst_7 {dimension_numbers = #tpu.dot_dimension_numbers<[1], [0], [0], [1], [0, 0, 1, 1], [], []>} : vector<8x8xf32>, vector<8x8xf32>, vector<8x8xf32> -> vector<8x8xf32>
    %cst_8 = arith.constant 0.353553385 : f32
    %12 = vector.broadcast %cst_8 : f32 to vector<8x8xf32>
    %13 = arith.mulf %11, %12 : vector<8x8xf32>
    %cst_9 = arith.constant dense<0xFF800000> : vector<8xf32>
    %14 = vector.multi_reduction <maximumf>, %13, %cst_9 [1] : vector<8x8xf32> to vector<8xf32>
    %15 = vector.shape_cast %14 : vector<8xf32> to vector<8x1xf32>
    %16 = vector.broadcast %15 : vector<8x1xf32> to vector<8x8xf32>
    %17 = arith.subf %13, %16 : vector<8x8xf32>
    %18 = math.exp %17 : vector<8x8xf32>
    %cst_10 = arith.constant dense<0.000000e+00> : vector<8xf32>
    %19 = vector.multi_reduction <add>, %18, %cst_10 [1] : vector<8x8xf32> to vector<8xf32>
    %20 = vector.shape_cast %19 : vector<8xf32> to vector<8x1xf32>
    %21 = tpu.reciprocal %20 : vector<8x1xf32> -> vector<8x1xf32>
    %22 = vector.broadcast %21 : vector<8x1xf32> to vector<8x8xf32>
    %23 = arith.mulf %18, %22 : vector<8x8xf32>
    %cst_11 = arith.constant dense<0.000000e+00> : vector<8x8xf32>
    %24 = tpu.matmul %23, %9, %cst_11 {dimension_numbers = #tpu.dot_dimension_numbers<[1], [0], [0], [1], [0, 0, 1, 1], [], []>} : vector<8x8xf32>, vector<8x8xf32>, vector<8x8xf32> -> vector<8x8xf32>
    %25 = vector.extract_strided_slice %6 {offsets = [0, 0], sizes = [8, 32], strides = [1, 1]} : vector<32x32xf32> to vector<8x32xf32>
    %cst_12 = arith.constant dense<0.000000e+00> : vector<8x32xf32>
    %26 = tpu.matmul %24, %25, %cst_12 {dimension_numbers = #tpu.dot_dimension_numbers<[1], [0], [0], [1], [0, 0, 1, 1], [], []>} : vector<8x8xf32>, vector<8x32xf32>, vector<8x32xf32> -> vector<8x32xf32>
    %27 = vector.extract_strided_slice %5 {offsets = [0, 8], sizes = [8, 8], strides = [1, 1]} : vector<16x96xf32> to vector<8x8xf32>
    %28 = vector.extract_strided_slice %5 {offsets = [0, 40], sizes = [8, 8], strides = [1, 1]} : vector<16x96xf32> to vector<8x8xf32>
    %29 = vector.extract_strided_slice %5 {offsets = [0, 72], sizes = [8, 8], strides = [1, 1]} : vector<16x96xf32> to vector<8x8xf32>
    %30 = tpu.transpose %28, [1, 0] : vector<8x8xf32> -> vector<8x8xf32>
    %cst_13 = arith.constant dense<0.000000e+00> : vector<8x8xf32>
    %31 = tpu.matmul %27, %30, %cst_13 {dimension_numbers = #tpu.dot_dimension_numbers<[1], [0], [0], [1], [0, 0, 1, 1], [], []>} : vector<8x8xf32>, vector<8x8xf32>, vector<8x8xf32> -> vector<8x8xf32>
    %cst_14 = arith.constant 0.353553385 : f32
    %32 = vector.broadcast %cst_14 : f32 to vector<8x8xf32>
    %33 = arith.mulf %31, %32 : vector<8x8xf32>
    %cst_15 = arith.constant dense<0xFF800000> : vector<8xf32>
    %34 = vector.multi_reduction <maximumf>, %33, %cst_15 [1] : vector<8x8xf32> to vector<8xf32>
    %35 = vector.shape_cast %34 : vector<8xf32> to vector<8x1xf32>
    %36 = vector.broadcast %35 : vector<8x1xf32> to vector<8x8xf32>
    %37 = arith.subf %33, %36 : vector<8x8xf32>
    %38 = math.exp %37 : vector<8x8xf32>
    %cst_16 = arith.constant dense<0.000000e+00> : vector<8xf32>
    %39 = vector.multi_reduction <add>, %38, %cst_16 [1] : vector<8x8xf32> to vector<8xf32>
    %40 = vector.shape_cast %39 : vector<8xf32> to vector<8x1xf32>
    %41 = tpu.reciprocal %40 : vector<8x1xf32> -> vector<8x1xf32>
    %42 = vector.broadcast %41 : vector<8x1xf32> to vector<8x8xf32>
    %43 = arith.mulf %38, %42 : vector<8x8xf32>
    %cst_17 = arith.constant dense<0.000000e+00> : vector<8x8xf32>
    %44 = tpu.matmul %43, %29, %cst_17 {dimension_numbers = #tpu.dot_dimension_numbers<[1], [0], [0], [1], [0, 0, 1, 1], [], []>} : vector<8x8xf32>, vector<8x8xf32>, vector<8x8xf32> -> vector<8x8xf32>
    %45 = vector.extract_strided_slice %6 {offsets = [8, 0], sizes = [8, 32], strides = [1, 1]} : vector<32x32xf32> to vector<8x32xf32>
    %cst_18 = arith.constant dense<0.000000e+00> : vector<8x32xf32>
    %46 = tpu.matmul %44, %45, %cst_18 {dimension_numbers = #tpu.dot_dimension_numbers<[1], [0], [0], [1], [0, 0, 1, 1], [], []>} : vector<8x8xf32>, vector<8x32xf32>, vector<8x32xf32> -> vector<8x32xf32>
    %47 = arith.addf %26, %46 : vector<8x32xf32>
    %48 = vector.extract_strided_slice %5 {offsets = [0, 16], sizes = [8, 8], strides = [1, 1]} : vector<16x96xf32> to vector<8x8xf32>
    %49 = vector.extract_strided_slice %5 {offsets = [0, 48], sizes = [8, 8], strides = [1, 1]} : vector<16x96xf32> to vector<8x8xf32>
    %50 = vector.extract_strided_slice %5 {offsets = [0, 80], sizes = [8, 8], strides = [1, 1]} : vector<16x96xf32> to vector<8x8xf32>
    %51 = tpu.transpose %49, [1, 0] : vector<8x8xf32> -> vector<8x8xf32>
    %cst_19 = arith.constant dense<0.000000e+00> : vector<8x8xf32>
    %52 = tpu.matmul %48, %51, %cst_19 {dimension_numbers = #tpu.dot_dimension_numbers<[1], [0], [0], [1], [0, 0, 1, 1], [], []>} : vector<8x8xf32>, vector<8x8xf32>, vector<8x8xf32> -> vector<8x8xf32>
    %cst_20 = arith.constant 0.353553385 : f32
    %53 = vector.broadcast %cst_20 : f32 to vector<8x8xf32>
    %54 = arith.mulf %52, %53 : vector<8x8xf32>
    %cst_21 = arith.constant dense<0xFF800000> : vector<8xf32>
    %55 = vector.multi_reduction <maximumf>, %54, %cst_21 [1] : vector<8x8xf32> to vector<8xf32>
    %56 = vector.shape_cast %55 : vector<8xf32> to vector<8x1xf32>
    %57 = vector.broadcast %56 : vector<8x1xf32> to vector<8x8xf32>
    %58 = arith.subf %54, %57 : vector<8x8xf32>
    %59 = math.exp %58 : vector<8x8xf32>
    %cst_22 = arith.constant dense<0.000000e+00> : vector<8xf32>
    %60 = vector.multi_reduction <add>, %59, %cst_22 [1] : vector<8x8xf32> to vector<8xf32>
    %61 = vector.shape_cast %60 : vector<8xf32> to vector<8x1xf32>
    %62 = tpu.reciprocal %61 : vector<8x1xf32> -> vector<8x1xf32>
    %63 = vector.broadcast %62 : vector<8x1xf32> to vector<8x8xf32>
    %64 = arith.mulf %59, %63 : vector<8x8xf32>
    %cst_23 = arith.constant dense<0.000000e+00> : vector<8x8xf32>
    %65 = tpu.matmul %64, %50, %cst_23 {dimension_numbers = #tpu.dot_dimension_numbers<[1], [0], [0], [1], [0, 0, 1, 1], [], []>} : vector<8x8xf32>, vector<8x8xf32>, vector<8x8xf32> -> vector<8x8xf32>
    %66 = vector.extract_strided_slice %6 {offsets = [16, 0], sizes = [8, 32], strides = [1, 1]} : vector<32x32xf32> to vector<8x32xf32>
    %cst_24 = arith.constant dense<0.000000e+00> : vector<8x32xf32>
    %67 = tpu.matmul %65, %66, %cst_24 {dimension_numbers = #tpu.dot_dimension_numbers<[1], [0], [0], [1], [0, 0, 1, 1], [], []>} : vector<8x8xf32>, vector<8x32xf32>, vector<8x32xf32> -> vector<8x32xf32>
    %68 = arith.addf %47, %67 : vector<8x32xf32>
    %69 = vector.extract_strided_slice %5 {offsets = [0, 24], sizes = [8, 8], strides = [1, 1]} : vector<16x96xf32> to vector<8x8xf32>
    %70 = vector.extract_strided_slice %5 {offsets = [0, 56], sizes = [8, 8], strides = [1, 1]} : vector<16x96xf32> to vector<8x8xf32>
    %71 = vector.extract_strided_slice %5 {offsets = [0, 88], sizes = [8, 8], strides = [1, 1]} : vector<16x96xf32> to vector<8x8xf32>
    %72 = tpu.transpose %70, [1, 0] : vector<8x8xf32> -> vector<8x8xf32>
    %cst_25 = arith.constant dense<0.000000e+00> : vector<8x8xf32>
    %73 = tpu.matmul %69, %72, %cst_25 {dimension_numbers = #tpu.dot_dimension_numbers<[1], [0], [0], [1], [0, 0, 1, 1], [], []>} : vector<8x8xf32>, vector<8x8xf32>, vector<8x8xf32> -> vector<8x8xf32>
    %cst_26 = arith.constant 0.353553385 : f32
    %74 = vector.broadcast %cst_26 : f32 to vector<8x8xf32>
    %75 = arith.mulf %73, %74 : vector<8x8xf32>
    %cst_27 = arith.constant dense<0xFF800000> : vector<8xf32>
    %76 = vector.multi_reduction <maximumf>, %75, %cst_27 [1] : vector<8x8xf32> to vector<8xf32>
    %77 = vector.shape_cast %76 : vector<8xf32> to vector<8x1xf32>
    %78 = vector.broadcast %77 : vector<8x1xf32> to vector<8x8xf32>
    %79 = arith.subf %75, %78 : vector<8x8xf32>
    %80 = math.exp %79 : vector<8x8xf32>
    %cst_28 = arith.constant dense<0.000000e+00> : vector<8xf32>
    %81 = vector.multi_reduction <add>, %80, %cst_28 [1] : vector<8x8xf32> to vector<8xf32>
    %82 = vector.shape_cast %81 : vector<8xf32> to vector<8x1xf32>
    %83 = tpu.reciprocal %82 : vector<8x1xf32> -> vector<8x1xf32>
    %84 = vector.broadcast %83 : vector<8x1xf32> to vector<8x8xf32>
    %85 = arith.mulf %80, %84 : vector<8x8xf32>
    %cst_29 = arith.constant dense<0.000000e+00> : vector<8x8xf32>
    %86 = tpu.matmul %85, %71, %cst_29 {dimension_numbers = #tpu.dot_dimension_numbers<[1], [0], [0], [1], [0, 0, 1, 1], [], []>} : vector<8x8xf32>, vector<8x8xf32>, vector<8x8xf32> -> vector<8x8xf32>
    %87 = vector.extract_strided_slice %6 {offsets = [24, 0], sizes = [8, 32], strides = [1, 1]} : vector<32x32xf32> to vector<8x32xf32>
    %cst_30 = arith.constant dense<0.000000e+00> : vector<8x32xf32>
    %88 = tpu.matmul %86, %87, %cst_30 {dimension_numbers = #tpu.dot_dimension_numbers<[1], [0], [0], [1], [0, 0, 1, 1], [], []>} : vector<8x8xf32>, vector<8x32xf32>, vector<8x32xf32> -> vector<8x32xf32>
    %89 = arith.addf %68, %88 : vector<8x32xf32>
    %90 = tpu.concatenate %23, %43, %64, %85 in 1 : vector<8x8xf32>, vector<8x8xf32>, vector<8x8xf32>, vector<8x8xf32> -> vector<8x32xf32>
    %c0_31 = arith.constant 0 : index
    %c0_32 = arith.constant 0 : index
    %c0_33 = arith.constant 0 : index
    %91 = vector.load %arg15[%c0_31, %c0_32, %c0_33] : memref<2x8x32xf32, #tpu.memory_space<vmem>>, vector<1x8x32xf32>
    %92 = vector.shape_cast %91 : vector<1x8x32xf32> to vector<8x32xf32>
    %93 = vector.shape_cast %90 : vector<8x32xf32> to vector<1x8x32xf32>
    tpu.vector_store %arg15[%c0_31, %c0_32, %c0_33], %93 {strides = array<i32>} : memref<2x8x32xf32, #tpu.memory_space<vmem>>, vector<1x8x32xf32>,
    %94 = vector.extract_strided_slice %5 {offsets = [8, 0], sizes = [8, 8], strides = [1, 1]} : vector<16x96xf32> to vector<8x8xf32>
    %95 = vector.extract_strided_slice %5 {offsets = [8, 32], sizes = [8, 8], strides = [1, 1]} : vector<16x96xf32> to vector<8x8xf32>
    %96 = vector.extract_strided_slice %5 {offsets = [8, 64], sizes = [8, 8], strides = [1, 1]} : vector<16x96xf32> to vector<8x8xf32>
    %97 = tpu.transpose %95, [1, 0] : vector<8x8xf32> -> vector<8x8xf32>
    %cst_34 = arith.constant dense<0.000000e+00> : vector<8x8xf32>
    %98 = tpu.matmul %94, %97, %cst_34 {dimension_numbers = #tpu.dot_dimension_numbers<[1], [0], [0], [1], [0, 0, 1, 1], [], []>} : vector<8x8xf32>, vector<8x8xf32>, vector<8x8xf32> -> vector<8x8xf32>
    %cst_35 = arith.constant 0.353553385 : f32
    %99 = vector.broadcast %cst_35 : f32 to vector<8x8xf32>
    %100 = arith.mulf %98, %99 : vector<8x8xf32>
    %cst_36 = arith.constant dense<0xFF800000> : vector<8xf32>
    %101 = vector.multi_reduction <maximumf>, %100, %cst_36 [1] : vector<8x8xf32> to vector<8xf32>
    %102 = vector.shape_cast %101 : vector<8xf32> to vector<8x1xf32>
    %103 = vector.broadcast %102 : vector<8x1xf32> to vector<8x8xf32>
    %104 = arith.subf %100, %103 : vector<8x8xf32>
    %105 = math.exp %104 : vector<8x8xf32>
    %cst_37 = arith.constant dense<0.000000e+00> : vector<8xf32>
    %106 = vector.multi_reduction <add>, %105, %cst_37 [1] : vector<8x8xf32> to vector<8xf32>
    %107 = vector.shape_cast %106 : vector<8xf32> to vector<8x1xf32>
    %108 = tpu.reciprocal %107 : vector<8x1xf32> -> vector<8x1xf32>
    %109 = vector.broadcast %108 : vector<8x1xf32> to vector<8x8xf32>
    %110 = arith.mulf %105, %109 : vector<8x8xf32>
    %cst_38 = arith.constant dense<0.000000e+00> : vector<8x8xf32>
    %111 = tpu.matmul %110, %96, %cst_38 {dimension_numbers = #tpu.dot_dimension_numbers<[1], [0], [0], [1], [0, 0, 1, 1], [], []>} : vector<8x8xf32>, vector<8x8xf32>, vector<8x8xf32> -> vector<8x8xf32>
    %112 = vector.extract_strided_slice %6 {offsets = [0, 0], sizes = [8, 32], strides = [1, 1]} : vector<32x32xf32> to vector<8x32xf32>
    %cst_39 = arith.constant dense<0.000000e+00> : vector<8x32xf32>
    %113 = tpu.matmul %111, %112, %cst_39 {dimension_numbers = #tpu.dot_dimension_numbers<[1], [0], [0], [1], [0, 0, 1, 1], [], []>} : vector<8x8xf32>, vector<8x32xf32>, vector<8x32xf32> -> vector<8x32xf32>
    %114 = vector.extract_strided_slice %5 {offsets = [8, 8], sizes = [8, 8], strides = [1, 1]} : vector<16x96xf32> to vector<8x8xf32>
    %115 = vector.extract_strided_slice %5 {offsets = [8, 40], sizes = [8, 8], strides = [1, 1]} : vector<16x96xf32> to vector<8x8xf32>
    %116 = vector.extract_strided_slice %5 {offsets = [8, 72], sizes = [8, 8], strides = [1, 1]} : vector<16x96xf32> to vector<8x8xf32>
    %117 = tpu.transpose %115, [1, 0] : vector<8x8xf32> -> vector<8x8xf32>
    %cst_40 = arith.constant dense<0.000000e+00> : vector<8x8xf32>
    %118 = tpu.matmul %114, %117, %cst_40 {dimension_numbers = #tpu.dot_dimension_numbers<[1], [0], [0], [1], [0, 0, 1, 1], [], []>} : vector<8x8xf32>, vector<8x8xf32>, vector<8x8xf32> -> vector<8x8xf32>
    %cst_41 = arith.constant 0.353553385 : f32
    %119 = vector.broadcast %cst_41 : f32 to vector<8x8xf32>
    %120 = arith.mulf %118, %119 : vector<8x8xf32>
    %cst_42 = arith.constant dense<0xFF800000> : vector<8xf32>
    %121 = vector.multi_reduction <maximumf>, %120, %cst_42 [1] : vector<8x8xf32> to vector<8xf32>
    %122 = vector.shape_cast %121 : vector<8xf32> to vector<8x1xf32>
    %123 = vector.broadcast %122 : vector<8x1xf32> to vector<8x8xf32>
    %124 = arith.subf %120, %123 : vector<8x8xf32>
    %125 = math.exp %124 : vector<8x8xf32>
    %cst_43 = arith.constant dense<0.000000e+00> : vector<8xf32>
    %126 = vector.multi_reduction <add>, %125, %cst_43 [1] : vector<8x8xf32> to vector<8xf32>
    %127 = vector.shape_cast %126 : vector<8xf32> to vector<8x1xf32>
    %128 = tpu.reciprocal %127 : vector<8x1xf32> -> vector<8x1xf32>
    %129 = vector.broadcast %128 : vector<8x1xf32> to vector<8x8xf32>
    %130 = arith.mulf %125, %129 : vector<8x8xf32>
    %cst_44 = arith.constant dense<0.000000e+00> : vector<8x8xf32>
    %131 = tpu.matmul %130, %116, %cst_44 {dimension_numbers = #tpu.dot_dimension_numbers<[1], [0], [0], [1], [0, 0, 1, 1], [], []>} : vector<8x8xf32>, vector<8x8xf32>, vector<8x8xf32> -> vector<8x8xf32>
    %132 = vector.extract_strided_slice %6 {offsets = [8, 0], sizes = [8, 32], strides = [1, 1]} : vector<32x32xf32> to vector<8x32xf32>
    %cst_45 = arith.constant dense<0.000000e+00> : vector<8x32xf32>
    %133 = tpu.matmul %131, %132, %cst_45 {dimension_numbers = #tpu.dot_dimension_numbers<[1], [0], [0], [1], [0, 0, 1, 1], [], []>} : vector<8x8xf32>, vector<8x32xf32>, vector<8x32xf32> -> vector<8x32xf32>
    %134 = arith.addf %113, %133 : vector<8x32xf32>
    %135 = vector.extract_strided_slice %5 {offsets = [8, 16], sizes = [8, 8], strides = [1, 1]} : vector<16x96xf32> to vector<8x8xf32>
    %136 = vector.extract_strided_slice %5 {offsets = [8, 48], sizes = [8, 8], strides = [1, 1]} : vector<16x96xf32> to vector<8x8xf32>
    %137 = vector.extract_strided_slice %5 {offsets = [8, 80], sizes = [8, 8], strides = [1, 1]} : vector<16x96xf32> to vector<8x8xf32>
    %138 = tpu.transpose %136, [1, 0] : vector<8x8xf32> -> vector<8x8xf32>
    %cst_46 = arith.constant dense<0.000000e+00> : vector<8x8xf32>
    %139 = tpu.matmul %135, %138, %cst_46 {dimension_numbers = #tpu.dot_dimension_numbers<[1], [0], [0], [1], [0, 0, 1, 1], [], []>} : vector<8x8xf32>, vector<8x8xf32>, vector<8x8xf32> -> vector<8x8xf32>
    %cst_47 = arith.constant 0.353553385 : f32
    %140 = vector.broadcast %cst_47 : f32 to vector<8x8xf32>
    %141 = arith.mulf %139, %140 : vector<8x8xf32>
    %cst_48 = arith.constant dense<0xFF800000> : vector<8xf32>
    %142 = vector.multi_reduction <maximumf>, %141, %cst_48 [1] : vector<8x8xf32> to vector<8xf32>
    %143 = vector.shape_cast %142 : vector<8xf32> to vector<8x1xf32>
    %144 = vector.broadcast %143 : vector<8x1xf32> to vector<8x8xf32>
    %145 = arith.subf %141, %144 : vector<8x8xf32>
    %146 = math.exp %145 : vector<8x8xf32>
    %cst_49 = arith.constant dense<0.000000e+00> : vector<8xf32>
    %147 = vector.multi_reduction <add>, %146, %cst_49 [1] : vector<8x8xf32> to vector<8xf32>
    %148 = vector.shape_cast %147 : vector<8xf32> to vector<8x1xf32>
    %149 = tpu.reciprocal %148 : vector<8x1xf32> -> vector<8x1xf32>
    %150 = vector.broadcast %149 : vector<8x1xf32> to vector<8x8xf32>
    %151 = arith.mulf %146, %150 : vector<8x8xf32>
    %cst_50 = arith.constant dense<0.000000e+00> : vector<8x8xf32>
    %152 = tpu.matmul %151, %137, %cst_50 {dimension_numbers = #tpu.dot_dimension_numbers<[1], [0], [0], [1], [0, 0, 1, 1], [], []>} : vector<8x8xf32>, vector<8x8xf32>, vector<8x8xf32> -> vector<8x8xf32>
    %153 = vector.extract_strided_slice %6 {offsets = [16, 0], sizes = [8, 32], strides = [1, 1]} : vector<32x32xf32> to vector<8x32xf32>
    %cst_51 = arith.constant dense<0.000000e+00> : vector<8x32xf32>
    %154 = tpu.matmul %152, %153, %cst_51 {dimension_numbers = #tpu.dot_dimension_numbers<[1], [0], [0], [1], [0, 0, 1, 1], [], []>} : vector<8x8xf32>, vector<8x32xf32>, vector<8x32xf32> -> vector<8x32xf32>
    %155 = arith.addf %134, %154 : vector<8x32xf32>
    %156 = vector.extract_strided_slice %5 {offsets = [8, 24], sizes = [8, 8], strides = [1, 1]} : vector<16x96xf32> to vector<8x8xf32>
    %157 = vector.extract_strided_slice %5 {offsets = [8, 56], sizes = [8, 8], strides = [1, 1]} : vector<16x96xf32> to vector<8x8xf32>
    %158 = vector.extract_strided_slice %5 {offsets = [8, 88], sizes = [8, 8], strides = [1, 1]} : vector<16x96xf32> to vector<8x8xf32>
    %159 = tpu.transpose %157, [1, 0] : vector<8x8xf32> -> vector<8x8xf32>
    %cst_52 = arith.constant dense<0.000000e+00> : vector<8x8xf32>
    %160 = tpu.matmul %156, %159, %cst_52 {dimension_numbers = #tpu.dot_dimension_numbers<[1], [0], [0], [1], [0, 0, 1, 1], [], []>} : vector<8x8xf32>, vector<8x8xf32>, vector<8x8xf32> -> vector<8x8xf32>
    %cst_53 = arith.constant 0.353553385 : f32
    %161 = vector.broadcast %cst_53 : f32 to vector<8x8xf32>
    %162 = arith.mulf %160, %161 : vector<8x8xf32>
    %cst_54 = arith.constant dense<0xFF800000> : vector<8xf32>
    %163 = vector.multi_reduction <maximumf>, %162, %cst_54 [1] : vector<8x8xf32> to vector<8xf32>
    %164 = vector.shape_cast %163 : vector<8xf32> to vector<8x1xf32>
    %165 = vector.broadcast %164 : vector<8x1xf32> to vector<8x8xf32>
    %166 = arith.subf %162, %165 : vector<8x8xf32>
    %167 = math.exp %166 : vector<8x8xf32>
    %cst_55 = arith.constant dense<0.000000e+00> : vector<8xf32>
    %168 = vector.multi_reduction <add>, %167, %cst_55 [1] : vector<8x8xf32> to vector<8xf32>
    %169 = vector.shape_cast %168 : vector<8xf32> to vector<8x1xf32>
    %170 = tpu.reciprocal %169 : vector<8x1xf32> -> vector<8x1xf32>
    %171 = vector.broadcast %170 : vector<8x1xf32> to vector<8x8xf32>
    %172 = arith.mulf %167, %171 : vector<8x8xf32>
    %cst_56 = arith.constant dense<0.000000e+00> : vector<8x8xf32>
    %173 = tpu.matmul %172, %158, %cst_56 {dimension_numbers = #tpu.dot_dimension_numbers<[1], [0], [0], [1], [0, 0, 1, 1], [], []>} : vector<8x8xf32>, vector<8x8xf32>, vector<8x8xf32> -> vector<8x8xf32>
    %174 = vector.extract_strided_slice %6 {offsets = [24, 0], sizes = [8, 32], strides = [1, 1]} : vector<32x32xf32> to vector<8x32xf32>
    %cst_57 = arith.constant dense<0.000000e+00> : vector<8x32xf32>
    %175 = tpu.matmul %173, %174, %cst_57 {dimension_numbers = #tpu.dot_dimension_numbers<[1], [0], [0], [1], [0, 0, 1, 1], [], []>} : vector<8x8xf32>, vector<8x32xf32>, vector<8x32xf32> -> vector<8x32xf32>
    %176 = arith.addf %155, %175 : vector<8x32xf32>
    %177 = tpu.concatenate %110, %130, %151, %172 in 1 : vector<8x8xf32>, vector<8x8xf32>, vector<8x8xf32>, vector<8x8xf32> -> vector<8x32xf32>
    %c1 = arith.constant 1 : index
    %c0_58 = arith.constant 0 : index
    %c0_59 = arith.constant 0 : index
    %178 = vector.load %arg15[%c1, %c0_58, %c0_59] : memref<2x8x32xf32, #tpu.memory_space<vmem>>, vector<1x8x32xf32>
    %179 = vector.shape_cast %178 : vector<1x8x32xf32> to vector<8x32xf32>
    %180 = vector.shape_cast %177 : vector<8x32xf32> to vector<1x8x32xf32>
    tpu.vector_store %arg15[%c1, %c0_58, %c0_59], %180 {strides = array<i32>} : memref<2x8x32xf32, #tpu.memory_space<vmem>>, vector<1x8x32xf32>,
    %181 = tpu.concatenate %89, %176 in 0 : vector<8x32xf32>, vector<8x32xf32> -> vector<16x32xf32>
    %c0_60 = arith.constant 0 : index
    %c0_61 = arith.constant 0 : index
    %182 = vector.load %arg5[%c0_60, %c0_61] : memref<1x32xf32, #tpu.memory_space<vmem>>, vector<1x32xf32>
    %183 = vector.broadcast %182 : vector<1x32xf32> to vector<16x32xf32>
    %184 = arith.addf %181, %183 : vector<16x32xf32>
    %185 = arith.addf %0, %184 : vector<16x32xf32>
    %c0_62 = arith.constant 0 : index
    %c0_63 = arith.constant 0 : index
    %186 = vector.load %arg10[%c0_62, %c0_63] : memref<1x32xf32, #tpu.memory_space<vmem>>, vector<1x32xf32>
    %c0_64 = arith.constant 0 : index
    %c0_65 = arith.constant 0 : index
    %187 = vector.load %arg11[%c0_64, %c0_65] : memref<1x32xf32, #tpu.memory_space<vmem>>, vector<1x32xf32>
    %cst_66 = arith.constant dense<0.000000e+00> : vector<16xf32>
    %188 = vector.multi_reduction <add>, %185, %cst_66 [1] : vector<16x32xf32> to vector<16xf32>
    %189 = vector.shape_cast %188 : vector<16xf32> to vector<16x1xf32>
    %cst_67 = arith.constant 3.200000e+01 : f32
    %190 = vector.broadcast %cst_67 : f32 to vector<16x1xf32>
    %191 = arith.divf %189, %190 : vector<16x1xf32>
    %192 = vector.broadcast %191 : vector<16x1xf32> to vector<16x32xf32>
    %193 = arith.subf %185, %192 : vector<16x32xf32>
    %194 = arith.mulf %193, %193 : vector<16x32xf32>
    %cst_68 = arith.constant dense<0.000000e+00> : vector<16xf32>
    %195 = vector.multi_reduction <add>, %194, %cst_68 [1] : vector<16x32xf32> to vector<16xf32>
    %196 = vector.shape_cast %195 : vector<16xf32> to vector<16x1xf32>
    %cst_69 = arith.constant 3.100000e+01 : f32
    %197 = vector.broadcast %cst_69 : f32 to vector<16x1xf32>
    %198 = arith.divf %196, %197 : vector<16x1xf32>
    %199 = math.sqrt %198 : vector<16x1xf32>
    %cst_70 = arith.constant 9.99999997E-7 : f32
    %200 = vector.broadcast %cst_70 : f32 to vector<16x1xf32>
    %201 = arith.addf %199, %200 : vector<16x1xf32>
    %202 = tpu.reciprocal %201 : vector<16x1xf32> -> vector<16x1xf32>
    %203 = vector.broadcast %191 : vector<16x1xf32> to vector<16x32xf32>
    %204 = arith.subf %185, %203 : vector<16x32xf32>
    %205 = vector.broadcast %186 : vector<1x32xf32> to vector<16x32xf32>
    %206 = arith.mulf %205, %204 : vector<16x32xf32>
    %207 = vector.broadcast %202 : vector<16x1xf32> to vector<16x32xf32>
    %208 = arith.mulf %206, %207 : vector<16x32xf32>
    %209 = vector.broadcast %187 : vector<1x32xf32> to vector<16x32xf32>
    %210 = arith.addf %208, %209 : vector<16x32xf32>
    %c0_71 = arith.constant 0 : index
    %c0_72 = arith.constant 0 : index
    %211 = vector.load %arg6[%c0_71, %c0_72] : memref<32x64xf32, #tpu.memory_space<vmem>>, vector<32x64xf32>
    %cst_73 = arith.constant dense<0.000000e+00> : vector<16x64xf32>
    %212 = tpu.matmul %210, %211, %cst_73 {dimension_numbers = #tpu.dot_dimension_numbers<[1], [0], [0], [1], [0, 0, 1, 1], [], []>} : vector<16x32xf32>, vector<32x64xf32>, vector<16x64xf32> -> vector<16x64xf32>
    %c0_74 = arith.constant 0 : index
    %c0_75 = arith.constant 0 : index
    %213 = vector.load %arg7[%c0_74, %c0_75] : memref<1x64xf32, #tpu.memory_space<vmem>>, vector<1x64xf32>
    %214 = vector.broadcast %213 : vector<1x64xf32> to vector<16x64xf32>
    %215 = arith.addf %212, %214 : vector<16x64xf32>
    %cst_76 = arith.constant 5.000000e-01 : f32
    %216 = vector.broadcast %cst_76 : f32 to vector<16x64xf32>
    %217 = arith.mulf %216, %215 : vector<16x64xf32>
    %cst_77 = arith.constant 4.471500e-02 : f32
    %218 = vector.broadcast %cst_77 : f32 to vector<16x64xf32>
    %219 = arith.mulf %218, %215 : vector<16x64xf32>
    %220 = arith.mulf %219, %215 : vector<16x64xf32>
    %221 = arith.mulf %220, %215 : vector<16x64xf32>
    %222 = arith.addf %215, %221 : vector<16x64xf32>
    %cst_78 = arith.constant 0.797884583 : f32
    %223 = vector.broadcast %cst_78 : f32 to vector<16x64xf32>
    %224 = arith.mulf %223, %222 : vector<16x64xf32>
    %225 = math.tanh %224 : vector<16x64xf32>
    %cst_79 = arith.constant 1.000000e+00 : f32
    %226 = vector.broadcast %cst_79 : f32 to vector<16x64xf32>
    %227 = arith.addf %226, %225 : vector<16x64xf32>
    %228 = arith.mulf %217, %227 : vector<16x64xf32>
    %c0_80 = arith.constant 0 : index
    %c0_81 = arith.constant 0 : index
    %229 = vector.load %arg8[%c0_80, %c0_81] : memref<64x32xf32, #tpu.memory_space<vmem>>, vector<64x32xf32>
    %cst_82 = arith.constant dense<0.000000e+00> : vector<16x32xf32>
    %230 = tpu.matmul %228, %229, %cst_82 {dimension_numbers = #tpu.dot_dimension_numbers<[1], [0], [0], [1], [0, 0, 1, 1], [], []>} : vector<16x64xf32>, vector<64x32xf32>, vector<16x32xf32> -> vector<16x32xf32>
    %c0_83 = arith.constant 0 : index
    %c0_84 = arith.constant 0 : index
    %231 = vector.load %arg9[%c0_83, %c0_84] : memref<1x32xf32, #tpu.memory_space<vmem>>, vector<1x32xf32>
    %232 = vector.broadcast %231 : vector<1x32xf32> to vector<16x32xf32>
    %233 = arith.addf %230, %232 : vector<16x32xf32>
    %234 = arith.addf %210, %233 : vector<16x32xf32>
    %c0_85 = arith.constant 0 : index
    %c0_86 = arith.constant 0 : index
    %235 = vector.load %arg12[%c0_85, %c0_86] : memref<1x32xf32, #tpu.memory_space<vmem>>, vector<1x32xf32>
    %c0_87 = arith.constant 0 : index
    %c0_88 = arith.constant 0 : index
    %236 = vector.load %arg13[%c0_87, %c0_88] : memref<1x32xf32, #tpu.memory_space<vmem>>, vector<1x32xf32>
    %cst_89 = arith.constant dense<0.000000e+00> : vector<16xf32>
    %237 = vector.multi_reduction <add>, %234, %cst_89 [1] : vector<16x32xf32> to vector<16xf32>
    %238 = vector.shape_cast %237 : vector<16xf32> to vector<16x1xf32>
    %cst_90 = arith.constant 3.200000e+01 : f32
    %239 = vector.broadcast %cst_90 : f32 to vector<16x1xf32>
    %240 = arith.divf %238, %239 : vector<16x1xf32>
    %241 = vector.broadcast %240 : vector<16x1xf32> to vector<16x32xf32>
    %242 = arith.subf %234, %241 : vector<16x32xf32>
    %243 = arith.mulf %242, %242 : vector<16x32xf32>
    %cst_91 = arith.constant dense<0.000000e+00> : vector<16xf32>
    %244 = vector.multi_reduction <add>, %243, %cst_91 [1] : vector<16x32xf32> to vector<16xf32>
    %245 = vector.shape_cast %244 : vector<16xf32> to vector<16x1xf32>
    %cst_92 = arith.constant 3.100000e+01 : f32
    %246 = vector.broadcast %cst_92 : f32 to vector<16x1xf32>
    %247 = arith.divf %245, %246 : vector<16x1xf32>
    %248 = math.sqrt %247 : vector<16x1xf32>
    %cst_93 = arith.constant 9.99999997E-7 : f32
    %249 = vector.broadcast %cst_93 : f32 to vector<16x1xf32>
    %250 = arith.addf %248, %249 : vector<16x1xf32>
    %251 = tpu.reciprocal %250 : vector<16x1xf32> -> vector<16x1xf32>
    %252 = vector.broadcast %240 : vector<16x1xf32> to vector<16x32xf32>
    %253 = arith.subf %234, %252 : vector<16x32xf32>
    %254 = vector.broadcast %235 : vector<1x32xf32> to vector<16x32xf32>
    %255 = arith.mulf %254, %253 : vector<16x32xf32>
    %256 = vector.broadcast %251 : vector<16x1xf32> to vector<16x32xf32>
    %257 = arith.mulf %255, %256 : vector<16x32xf32>
    %258 = vector.broadcast %236 : vector<1x32xf32> to vector<16x32xf32>
    %259 = arith.addf %257, %258 : vector<16x32xf32>
    %c0_94 = arith.constant 0 : index
    %c0_95 = arith.constant 0 : index
    %260 = vector.load %arg14[%c0_94, %c0_95] : memref<16x32xf32, #tpu.memory_space<vmem>>, vector<16x32xf32>
    tpu.vector_store %arg14[%c0_94, %c0_95], %259 {strides = array<i32>} : memref<16x32xf32, #tpu.memory_space<vmem>>, vector<16x32xf32>,
    return
  }
  func.func @transform_0(%arg0: i32) -> (i32, i32) {
    %c0_i32 = arith.constant 0 : i32
    %c0_i32_0 = arith.constant 0 : i32
    return %arg0, %c0_i32 : i32, i32
  }
  func.func @transform_1(%arg0: i32) -> (i32, i32) {
    %c0_i32 = arith.constant 0 : i32
    %c0_i32_0 = arith.constant 0 : i32
    %c0_i32_1 = arith.constant 0 : i32
    return %c0_i32, %c0_i32_0 : i32, i32
  }
  func.func @transform_2(%arg0: i32) -> (i32, i32) {
    %c0_i32 = arith.constant 0 : i32
    %c0_i32_0 = arith.constant 0 : i32
    %c0_i32_1 = arith.constant 0 : i32
    return %c0_i32, %c0_i32_0 : i32, i32
  }
  func.func @transform_3(%arg0: i32) -> (i32, i32) {
    %c0_i32 = arith.constant 0 : i32
    %c0_i32_0 = arith.constant 0 : i32
    %c0_i32_1 = arith.constant 0 : i32
    return %c0_i32, %c0_i32_0 : i32, i32
  }
  func.func @transform_4(%arg0: i32) -> (i32, i32) {
    %c0_i32 = arith.constant 0 : i32
    %c0_i32_0 = arith.constant 0 : i32
    %c0_i32_1 = arith.constant 0 : i32
    return %c0_i32, %c0_i32_0 : i32, i32
  }
  func.func @transform_5(%arg0: i32) -> (i32, i32) {
    %c0_i32 = arith.constant 0 : i32
    %c0_i32_0 = arith.constant 0 : i32
    %c0_i32_1 = arith.constant 0 : i32
    return %c0_i32, %c0_i32_0 : i32, i32
  }
  func.func @transform_6(%arg0: i32) -> (i32, i32) {
    %c0_i32 = arith.constant 0 : i32
    %c0_i32_0 = arith.constant 0 : i32
    %c0_i32_1 = arith.constant 0 : i32
    return %c0_i32, %c0_i32_0 : i32, i32
  }
  func.func @transform_7(%arg0: i32) -> (i32, i32) {
    %c0_i32 = arith.constant 0 : i32
    %c0_i32_0 = arith.constant 0 : i32
    %c0_i32_1 = arith.constant 0 : i32
    return %c0_i32, %c0_i32_0 : i32, i32
  }
  func.func @transform_8(%arg0: i32) -> (i32, i32) {
    %c0_i32 = arith.constant 0 : i32
    %c0_i32_0 = arith.constant 0 : i32
    %c0_i32_1 = arith.constant 0 : i32
    return %c0_i32, %c0_i32_0 : i32, i32
  }
  func.func @transform_9(%arg0: i32) -> (i32, i32) {
    %c0_i32 = arith.constant 0 : i32
    %c0_i32_0 = arith.constant 0 : i32
    %c0_i32_1 = arith.constant 0 : i32
    return %c0_i32, %c0_i32_0 : i32, i32
  }
  func.func @transform_10(%arg0: i32) -> (i32, i32) {
    %c0_i32 = arith.constant 0 : i32
    %c0_i32_0 = arith.constant 0 : i32
    %c0_i32_1 = arith.constant 0 : i32
    return %c0_i32, %c0_i32_0 : i32, i32
  }
  func.func @transform_11(%arg0: i32) -> (i32, i32) {
    %c0_i32 = arith.constant 0 : i32
    %c0_i32_0 = arith.constant 0 : i32
    %c0_i32_1 = arith.constant 0 : i32
    return %c0_i32, %c0_i32_0 : i32, i32
  }
  func.func @transform_12(%arg0: i32) -> (i32, i32) {
    %c0_i32 = arith.constant 0 : i32
    %c0_i32_0 = arith.constant 0 : i32
    %c0_i32_1 = arith.constant 0 : i32
    return %c0_i32, %c0_i32_0 : i32, i32
  }
  func.func @transform_13(%arg0: i32) -> (i32, i32) {
    %c0_i32 = arith.constant 0 : i32
    %c0_i32_0 = arith.constant 0 : i32
    return %arg0, %c0_i32 : i32, i32
  }
  func.func @transform_14(%arg0: i32) -> (i32, i32, i32) {
    %c0_i32 = arith.constant 0 : i32
    %c0_i32_0 = arith.constant 0 : i32
    %c0_i32_1 = arith.constant 0 : i32
    return %arg0, %c0_i32, %c0_i32_0 : i32, i32, i32
  }
}

</mosaic_0001>

<bundles_post_ra>
// kernel: tpu_custom_call.1
= control target key start
LH: loop header
LB: loop body
LE: loop exit
PB: predicated region body
PF: predicated region fallthrough
CT: control target
= control target key end

     0   :  { %20 = vsyncpa [#allocation3], 0  ;;  %s1931_s0 = inlined_call_operand.hbm [shape: f32[16,32], index: 0, kind: input, shape index: {}]   ;;  %s1932_s1 = inlined_call_operand.vmem [shape: f32[32,96], index: 1, kind: input, shape index: {}]   ;;  %s1933_s2 = inlined_call_operand.vmem [shape: f32[1,96], index: 2, kind: input, shape index: {}]   ;;  %s1934_s3 = inlined_call_operand.vmem [shape: f32[32,32], index: 3, kind: input, shape index: {}]   ;;  %s1935_s4 = inlined_call_operand.vmem [shape: f32[1,32], index: 4, kind: input, shape index: {}]   ;;  %s1936_s5 = inlined_call_operand.vmem [shape: f32[32,64], index: 5, kind: input, shape index: {}]   ;;  %s1937_s6 = inlined_call_operand.vmem [shape: f32[1,64], index: 6, kind: input, shape index: {}]   ;;  %s1938_s7 = inlined_call_operand.vmem [shape: f32[64,32], index: 7, kind: input, shape index: {}]   ;;  %s1939_s8 = inlined_call_operand.vmem [shape: f32[1,32], index: 8, kind: input, shape index: {}]   ;;  %s1940_s9 = inlined_call_operand.vmem [shape: f32[1,32], index: 9, kind: input, shape index: {}]   ;;  %s1941_s10 = inlined_call_operand.vmem [shape: f32[1,32], index: 10, kind: input, shape index: {}]   ;;  %s1942_s11 = inlined_call_operand.vmem [shape: f32[1,32], index: 11, kind: input, shape index: {}]   ;;  %s1943_s12 = inlined_call_operand.vmem [shape: f32[1,32], index: 12, kind: input, shape index: {}]   ;;  %s1944_s13 = inlined_call_operand.hbm [shape: f32[16,32], index: 13, kind: output, shape index: {0}]   ;;  %s1945_s14 = inlined_call_operand.hbm [shape: f32[2,8,32], index: 14, kind: output, shape index: {1}]  }
   0x1   :  { %21 = vsyncpa [#allocation4], 0 }
   0x2   :  { %22 = vsyncpa [#allocation7], 0  ;;  %s27_s15 = sshll.u32 %s1931_s0, 4  ;;  %s1496_s16 = smov [#allocation2]   ;;  %s28_s15 = int_to_ptr.hbm [resolvable:$true] %s27_s15 }
   0x3   :  { %s29_s17 = sshll.u32 %s1496_s16, 4  ;;  %s1497_s18 = smov 128   ;;  %s30_s17 = int_to_ptr.vmem [resolvable:$true] %s29_s17 }
   0x4   :  { %s1498_s19 = smov 8  }
   0x5   :  { %35 = dma.hbm_to_vmem [thread:$0]  %s28_s15, 256, %s30_s17, [#allocation3], %s1497_s18, %s1497_s18, %s1498_s19  }
   0x6   :  { %1490 = dma.done.wait [#allocation3], 256  }
   0x7   :  { %1491 = vsyncadd [#allocation3], 4294967040  ;;  %v69_v0 = vld [vmem:[%s1932_s1 + $0x18] sm:$0xff]  ;;  %v68_v1 = vld [vmem:[%s1932_s1 + $0x10] sm:$0xff]  ;;  %vm74_vm0 = vcmask 261120   ;;  %s1499_s29 = smov 120  }
   0x8   :  { %93 = vmatpush.msra.mxu0 %v69_v0  ;;  %1330 = vmatpush.msra.mxu2 %v69_v0  ;;  %v67_v2 = vld [vmem:[%s1932_s1 + $0x8] sm:$0xff]  ;;  %v66_v3 = vld [vmem:[%s1932_s1] sm:$0xff]  ;;  %s1500_s1 = smov 96   ;;  %s1501_s30 = smov 88   ;;  %vm111_vm1 = vcmask 64512   ;;  %v106_v62 = vld [vmem:[%s1934_s3 + $0x10] sm:$0xff] }
   0x9   :  { %v1609_v4 = vld [vmem:[#allocation2] sm:$0xff]  ;;  %v1623_v8 = vld [vmem:[#allocation2 + $0x8] sm:$0xff]  ;;  %s1503_s15 = smov 72   ;;  %s1504_s16 = smov 64  }
   0xa   :  { %94 = vmatpush.msra.mxu0 %v68_v1  ;;  %1331 = vmatpush.msra.mxu2 %v68_v1  ;;  %v1354_v5 = vld [vmem:[%s1933_s2] ss:$0 sm:$0xff]  ;;  %s1502_s2 = smov 112   ;;  %s1505_s17 = smov 56   ;;  %v105_v59 = vld [vmem:[%s1934_s3 + $0x8] sm:$0xff] }
   0xb   :  { %s1506_s20 = smov 80   ;;  %v104_v58 = vld [vmem:[%s1934_s3] sm:$0xff]  ;;  %s1507_s26 = smov 48  }
   0xc   :  { %95 = vmatpush.msra.mxu0 %v67_v2  ;;  %1332 = vmatpush.msra.mxu2 %v67_v2  ;;  %s1508_s27 = smov 104   ;;  %s1509_s28 = smov 40  }
   0xe   :  { %96 = vmatpush.msra.mxu0 %v66_v3  ;;  %1333 = vmatpush.msra.mxu2 %v66_v3 }
   0xf   :  { %1292 = vmatmul.msk.f32.vlgmr.msra.gmra.mxu0 %vm74_vm0, %v1609_v4  ;;  %1293 = vmatmul.msk.f32.vlgmr.msra.gmra.mxu2 %vm74_vm0, %v1623_v8 }
  0x8c   :  { %v98_v6 = vpop.f32.mrf.mxu0 }
  0x8d   :  { %v1616_v7 = vadd.f32 %v1354_v5, %v98_v6 }
  0x8f   :  { %187 = vrot.lane.b32.xlu1 %v1616_v7, %s1499_s29  ;;  %109 = vrot.lane.b32.xlu0 %v1616_v7, %s1500_s1 }
  0x92   :  { %v101_v18 = vpop.f32.mrf.mxu2 }
  0x93   :  { %v1636_v19 = vadd.f32 %v1354_v5, %v101_v18 }
  0x97   :  { %189 = vrot.lane.b32.xlu0 %v1616_v7, %s1501_s30 }
 0x101   :  { %v110_v9 = vpop.permute.xlu0 %109  ;;  %v188_v11 = vpop.permute.xlu1 %187 }
 0x102   :  { %1294 = vmatpush.xpose.msk.msra.mxu1 %vm111_vm1, %v110_v9 }
 0x105   :  { %1295 = vmatmul.msk.f32.vlgmr.msra.gmra.mxu1 %vm111_vm1, %v1616_v7 }
 0x106   :  { %284 = vmatpush.msrb.mxu1 %v105_v59 }
 0x109   :  { %v190_v10 = vpop.permute.xlu0 %189 }
 0x10a   :  { %1297 = vmatpush.xpose.msk.msra.mxu3 %vm111_vm1, %v190_v10 }
 0x10d   :  { %1298 = vmatmul.msk.f32.vlgmr.msra.gmra.mxu3 %vm111_vm1, %v188_v11 }
 0x10e   :  { %307 = vmatpush.msrb.mxu3 %v104_v58 }
 0x110   :  { %409 = vmatpush.msra.mxu3 %v106_v62 }
 0x182   :  { %v133_v12 = vpop.f32.mrf.mxu1 }
 0x183   :  { %v136_v13 = vmul.f32 0.35355338, %v133_v12 }
 0x185   :  { %v137_v14 = vsel %vm111_vm1, %v136_v13, -inf }
 0x186   :  { %138 = vmax.xlane.f32.xlu1 %v137_v14 }
 0x190   :  { %v212_v15 = vpop.f32.mrf.mxu3 }
 0x191   :  { %v215_v16 = vmul.f32 0.35355338, %v212_v15 }
 0x193   :  { %v216_v17 = vsel %vm111_vm1, %v215_v16, -inf }
 0x194   :  { %217 = vmax.xlane.f32.xlu2 %v216_v17 }
 0x19f   :  { %312 = vrot.lane.b32.xlu1 %v1616_v7, %s1502_s2 }
 0x1a7   :  { %534 = vrot.lane.b32.xlu1 %v1636_v19, %s1500_s1  ;;  %s1261_s1 = sshll.u32 %s1944_s13, 4  ;;  %s1262_s1 = int_to_ptr.hbm [resolvable:$true] %s1261_s1 }
 0x1af   :  { %417 = vrot.lane.b32.xlu1 %v1616_v7, %s1503_s15 }
 0x1f9   :  { %v139_v20 = vpop.xlane.xlu1 %138 }
 0x1fa   :  { %v140_v21 = vsub.f32 %v136_v13, %v139_v20 }
 0x1fc   :  { %v141_v22 = vmul.f32 1.442695, %v140_v21 }
 0x1fe   :  { %1362 = vpow2.f32 %v141_v22 }
 0x204   :  { %v1363_v23 = vpop.eup %1362 }
 0x205   :  { %v143_v24 = vsel %vm111_vm1, %v1363_v23, 0.0 }
 0x206   :  { %144 = vadd.xlane.f32.xlu2 %v143_v24 }
 0x207   :  { %v218_v25 = vpop.xlane.xlu2 %217 }
 0x208   :  { %v219_v26 = vsub.f32 %v215_v16, %v218_v25 }
 0x20a   :  { %v220_v27 = vmul.f32 1.442695, %v219_v26 }
 0x20c   :  { %1364 = vpow2.f32 %v220_v27 }
 0x211   :  { %v313_v57 = vpop.permute.xlu1 %312 }
 0x212   :  { %v1365_v28 = vpop.eup %1364 }
 0x213   :  { %v222_v29 = vsel %vm111_vm1, %v1365_v28, 0.0 }
 0x214   :  { %223 = vadd.xlane.f32.xlu0 %v222_v29 }
 0x219   :  { %v535_v63 = vpop.permute.xlu1 %534 }
 0x21e   :  { %161 = vrot.lane.b32.xlu2 %v1616_v7, %s1504_s16 }
 0x221   :  { %v418_v26 = vpop.permute.xlu1 %417 }
 0x226   :  { %240 = vrot.lane.b32.xlu2 %v1616_v7, %s1505_s17 }
 0x22e   :  { %314 = vrot.lane.b32.xlu2 %v1616_v7, %s1506_s20 }
 0x279   :  { %v145_v30 = vpop.xlane.xlu2 %144 }
 0x27a   :  { %1366 = vrcp.f32 %v145_v30  ;;  %v157_v35 = vand.u32 2147483648, %v145_v30  ;;  %v155_v37 = vand.u32 2147483647, %v145_v30  ;;  %vm151_vm3 = vweird.f32 %v145_v30 }
 0x27c   :  { %v158_v40 = vor.u32 1.1754944e-38, %v157_v35  ;;  %vm156_vm5 = vcmp.eq.f32.partialorder %v155_v37, 8.507059e+37 }
 0x280   :  { %v1367_v31 = vpop.eup %1366 }
 0x281   :  { %v147_v32 = vmul.f32 %v1367_v31, %v145_v30  ;;  %v162_v33 = vpop.permute.xlu2 %161  ;;  %vm152_vm2 = vweird.f32 %v1367_v31 }
 0x282   :  { %182 = vmatpush.msrb.mxu2 %v162_v33  ;;  %vm153_vm4 = vmor %vm151_vm3, %vm152_vm2 }
 0x283   :  { %v148_v34 = vsub.f32 1.0, %v147_v32 }
 0x285   :  { %v149_v36 = vmul.f32 %v1367_v31, %v148_v34 }
 0x287   :  { %v150_v38 = vadd.f32 %v1367_v31, %v149_v36  ;;  %v224_v39 = vpop.xlane.xlu0 %223 }
 0x288   :  { %1368 = vrcp.f32 %v224_v39  ;;  %v236_v49 = vand.u32 2147483648, %v224_v39  ;;  %v234_v51 = vand.u32 2147483647, %v224_v39  ;;  %vm230_vm7 = vweird.f32 %v224_v39 }
 0x289   :  { %v241_v41 = vpop.permute.xlu2 %240  ;;  %v154_v42 = vsel %vm153_vm4, %v1367_v31, %v150_v38 }
 0x28a   :  { %261 = vmatpush.msra.mxu2 %v241_v41  ;;  %v159_v43 = vsel %vm156_vm5, %v158_v40, %v154_v42  ;;  %v237_v53 = vor.u32 1.1754944e-38, %v236_v49  ;;  %vm235_vm9 = vcmp.eq.f32.partialorder %v234_v51, 8.507059e+37 }
 0x28b   :  { %v1649_v44 = vmul.f32 %v1363_v23, %v159_v43 }
 0x28d   :  { %1296 = vmatmul.msk.f32.vlgmr.msrb.gmra.mxu2 %vm111_vm1, %v1649_v44 }
 0x28e   :  { %v1369_v45 = vpop.eup %1368 }
 0x28f   :  { %v226_v46 = vmul.f32 %v1369_v45, %v224_v39  ;;  %vm231_vm6 = vweird.f32 %v1369_v45 }
 0x290   :  { %vm232_vm8 = vmor %vm230_vm7, %vm231_vm6 }
 0x291   :  { %v227_v47 = vsub.f32 1.0, %v226_v46  ;;  %v315_v48 = vpop.permute.xlu2 %314 }
 0x292   :  { %1302 = vmatpush.xpose.msk.msrb.mxu2 %vm111_vm1, %v315_v48 }
 0x293   :  { %v228_v50 = vmul.f32 %v1369_v45, %v227_v47 }
 0x295   :  { %v229_v52 = vadd.f32 %v1369_v45, %v228_v50 }
 0x297   :  { %v233_v54 = vsel %vm232_vm8, %v1369_v45, %v229_v52 }
 0x298   :  { %v238_v55 = vsel %vm235_vm9, %v237_v53, %v233_v54 }
 0x299   :  { %v1654_v56 = vmul.f32 %v1365_v28, %v238_v55 }
 0x29b   :  { %1299 = vmatmul.msk.f32.vlgmr.msra.gmra.mxu2 %vm111_vm1, %v1654_v56 }
 0x2a3   :  { %1303 = vmatmul.msk.f32.vlgmr.msrb.gmra.mxu2 %vm111_vm1, %v313_v57 }
 0x310   :  { %v184_v60 = vpop.f32.mrf.mxu2 }
 0x311   :  { %1301 = vmatmul.msk.f32.vlgmr.msrb.gmra.mxu3 %vm111_vm1, %v184_v60 }
 0x312   :  { %1310 = vmatpush.xpose.msk.msrb.mxu3 %vm111_vm1, %v535_v63 }
 0x31e   :  { %v263_v61 = vpop.f32.mrf.mxu2 }
 0x31f   :  { %1300 = vmatmul.msk.f32.vlgmr.msrb.gmra.mxu1 %vm111_vm1, %v263_v61 }
 0x326   :  { %v337_v0 = vpop.f32.mrf.mxu2 }
 0x327   :  { %v340_v1 = vmul.f32 0.35355338, %v337_v0 }
 0x329   :  { %v341_v2 = vsel %vm111_vm1, %v340_v1, -inf }
 0x32a   :  { %342 = vmax.xlane.f32.xlu2 %v341_v2 }
 0x342   :  { %585 = vrot.lane.b32.xlu2 %v1636_v19, %s1504_s16 }
 0x394   :  { %v1693_v33 = vpop.f32.mrf.mxu3 }
 0x39c   :  { %v1685_v28 = vpop.f32.mrf.mxu1 }
 0x39d   :  { %v343_v3 = vpop.xlane.xlu2 %342 }
 0x39e   :  { %v344_v5 = vsub.f32 %v340_v1, %v343_v3 }
 0x3a0   :  { %v345_v6 = vmul.f32 1.442695, %v344_v5 }
 0x3a2   :  { %1370 = vpow2.f32 %v345_v6 }
 0x3a5   :  { %v586_v9 = vpop.permute.xlu2 %585 }
 0x3a6   :  { %606 = vmatpush.msrb.mxu0 %v586_v9 }
 0x3a8   :  { %731 = vmatpush.msra.mxu0 %v104_v58  ;;  %v1371_v10 = vpop.eup %1370 }
 0x3a9   :  { %v347_v11 = vsel %vm111_vm1, %v1371_v10, 0.0 }
 0x3aa   :  { %348 = vadd.xlane.f32.xlu0 %v347_v11 }
 0x3be   :  { %365 = vrot.lane.b32.xlu0 %v1616_v7, %s1507_s26 }
 0x3c6   :  { %415 = vrot.lane.b32.xlu0 %v1616_v7, %s1508_s27 }
 0x41d   :  { %v349_v12 = vpop.xlane.xlu0 %348 }
 0x41e   :  { %1372 = vrcp.f32 %v349_v12  ;;  %v361_v16 = vand.u32 2147483648, %v349_v12  ;;  %v359_v18 = vand.u32 2147483647, %v349_v12  ;;  %vm355_vm11 = vweird.f32 %v349_v12 }
 0x420   :  { %v362_v21 = vor.u32 1.1754944e-38, %v361_v16  ;;  %vm360_vm13 = vcmp.eq.f32.partialorder %v359_v18, 8.507059e+37  ;;  %v1728_v18 = vld [vmem:[%s1934_s3 + $0x18] sm:$0xff] }
 0x424   :  { %v1373_v13 = vpop.eup %1372 }
 0x425   :  { %v351_v14 = vmul.f32 %v1373_v13, %v349_v12  ;;  %vm356_vm10 = vweird.f32 %v1373_v13 }
 0x426   :  { %vm357_vm12 = vmor %vm355_vm11, %vm356_vm10 }
 0x427   :  { %v352_v15 = vsub.f32 1.0, %v351_v14 }
 0x429   :  { %v353_v17 = vmul.f32 %v1373_v13, %v352_v15 }
 0x42b   :  { %v354_v20 = vadd.f32 %v1373_v13, %v353_v17 }
 0x42d   :  { %v358_v22 = vsel %vm357_vm12, %v1373_v13, %v354_v20 }
 0x42e   :  { %v363_v23 = vsel %vm360_vm13, %v362_v21, %v358_v22 }
 0x42f   :  { %v1679_v24 = vmul.f32 %v1371_v10, %v363_v23 }
 0x430   :  { %v366_v25 = vpop.permute.xlu0 %365 }
 0x431   :  { %386 = vmatpush.msra.mxu1 %v366_v25 }
 0x432   :  { %1304 = vmatmul.msk.f32.vlgmr.msra.gmra.mxu1 %vm111_vm1, %v1679_v24 }
 0x433   :  { %1306 = vmatpush.xpose.msk.msrb.mxu1 %vm111_vm1, %v418_v26 }
 0x437   :  { %512 = vmatpush.msra.mxu1 %v1728_v18 }
 0x438   :  { %v416_v27 = vpop.permute.xlu0 %415 }
 0x43a   :  { %1307 = vmatmul.msk.f32.vlgmr.msrb.gmra.mxu1 %vm111_vm1, %v416_v27 }
 0x4af   :  { %v388_v29 = vpop.f32.mrf.mxu1 }
 0x4b0   :  { %1305 = vmatmul.msk.f32.vlgmr.msra.gmra.mxu3 %vm111_vm1, %v388_v29 }
 0x4b1   :  { %708 = vmatpush.msra.mxu3 %v105_v59 }
 0x4b7   :  { %v440_v30 = vpop.f32.mrf.mxu1 }
 0x4b8   :  { %v443_v31 = vmul.f32 0.35355338, %v440_v30  ;;  %1311 = vmatmul.msk.f32.vlgmr.msrb.gmra.mxu3 %vm111_vm1, %v1636_v19 }
 0x4b9   :  { %833 = vmatpush.msrb.mxu3 %v106_v62 }
 0x4ba   :  { %v444_v32 = vsel %vm111_vm1, %v443_v31, -inf }
 0x4bb   :  { %445 = vmax.xlane.f32.xlu2 %v444_v32 }
 0x4d3   :  { %738 = vrot.lane.b32.xlu2 %v1636_v19, %s1506_s20 }
 0x52e   :  { %v446_v34 = vpop.xlane.xlu2 %445 }
 0x52f   :  { %v447_v36 = vsub.f32 %v443_v31, %v446_v34 }
 0x531   :  { %v448_v37 = vmul.f32 1.442695, %v447_v36 }
 0x533   :  { %v1695_v35 = vpop.f32.mrf.mxu3  ;;  %1374 = vpow2.f32 %v448_v37 }
 0x536   :  { %v739_v15 = vpop.permute.xlu2 %738 }
 0x539   :  { %v1375_v41 = vpop.eup %1374 }
 0x53a   :  { %v450_v42 = vsel %vm111_vm1, %v1375_v41, 0.0 }
 0x53b   :  { %v557_v38 = vpop.f32.mrf.mxu3 }
 0x53c   :  { %v560_v39 = vmul.f32 0.35355338, %v557_v38 }
 0x53e   :  { %v561_v40 = vsel %vm111_vm1, %v560_v39, -inf }
 0x53f   :  { %562 = vmax.xlane.f32.xlu1 %v561_v40 }
 0x547   :  { %451 = vadd.xlane.f32.xlu1 %v450_v42 }
 0x560   :  { %613 = vrot.lane.b32.xlu1 %v1636_v19, %s1501_s30 }
 0x568   :  { %841 = vrot.lane.b32.xlu1 %v1636_v19, %s1503_s15 }
 0x5b2   :  { %v563_v43 = vpop.xlane.xlu1 %562 }
 0x5b3   :  { %v564_v45 = vsub.f32 %v560_v39, %v563_v43 }
 0x5b5   :  { %v565_v46 = vmul.f32 1.442695, %v564_v45 }
 0x5b7   :  { %1376 = vpow2.f32 %v565_v46 }
 0x5ba   :  { %v452_v49 = vpop.xlane.xlu1 %451 }
 0x5bb   :  { %1378 = vrcp.f32 %v452_v49  ;;  %v464_v58 = vand.u32 2147483648, %v452_v49  ;;  %vm458_vm15 = vweird.f32 %v452_v49  ;;  %v462_v61 = vand.u32 2147483647, %v452_v49 }
 0x5bd   :  { %v1377_v47 = vpop.eup %1376  ;;  %v465_v2 = vor.u32 1.1754944e-38, %v464_v58  ;;  %vm463_vm5 = vcmp.eq.f32.partialorder %v462_v61, 8.507059e+37 }
 0x5be   :  { %v567_v48 = vsel %vm111_vm1, %v1377_v47, 0.0 }
 0x5bf   :  { %568 = vadd.xlane.f32.xlu0 %v567_v48  ;;  %v310_v48 = vadd.f32 %v1693_v33, %v1685_v28 }
 0x5c1   :  { %v1379_v50 = vpop.eup %1378 }
 0x5c2   :  { %v454_v51 = vmul.f32 %v1379_v50, %v452_v49  ;;  %vm459_vm14 = vweird.f32 %v1379_v50 }
 0x5c3   :  { %vm460_vm2 = vmor %vm458_vm15, %vm459_vm14 }
 0x5c4   :  { %v455_v53 = vsub.f32 1.0, %v454_v51 }
 0x5c6   :  { %v456_v54 = vmul.f32 %v1379_v50, %v455_v53 }
 0x5d2   :  { %v614_v59 = vpop.permute.xlu1 %613 }
 0x5d3   :  { %468 = vrot.lane.b32.xlu0 %v1616_v7, %s1509_s28  ;;  %v457_v7 = vadd.f32 %v1379_v50, %v456_v54 }
 0x5d5   :  { %v461_v1 = vsel %vm460_vm2, %v1379_v50, %v457_v7  ;;  %v414_v50 = vadd.f32 %v1695_v35, %v310_v48 }
 0x5d6   :  { %v466_v6 = vsel %vm463_vm5, %v465_v2, %v461_v1 }
 0x5d7   :  { %v1714_v13 = vmul.f32 %v1375_v41, %v466_v6 }
 0x5da   :  { %v842_v14 = vpop.permute.xlu1 %841 }
 0x5db   :  { %611 = vrot.lane.b32.xlu0 %v1636_v19, %s1499_s29 }
 0x5e3   :  { %736 = vrot.lane.b32.xlu0 %v1636_v19, %s1502_s2 }
 0x5eb   :  { %839 = vrot.lane.b32.xlu0 %v1636_v19, %s1508_s27  ;;  %s1274_s27 = sshll.u32 %s1945_s14, 4  ;;  %s1515_s14 = smov [#allocation5]   ;;  %s1275_s27 = int_to_ptr.hbm [resolvable:$true] %s1274_s27 }
 0x632   :  { %v569_v52 = vpop.xlane.xlu0 %568 }
 0x633   :  { %1380 = vrcp.f32 %v569_v52  ;;  %v581_v62 = vand.u32 2147483648, %v569_v52  ;;  %v579_v0 = vand.u32 2147483647, %v569_v52  ;;  %vm575_vm4 = vweird.f32 %v569_v52 }
 0x635   :  { %v582_v5 = vor.u32 1.1754944e-38, %v581_v62  ;;  %vm580_vm7 = vcmp.eq.f32.partialorder %v579_v0, 8.507059e+37 }
 0x639   :  { %v1381_v55 = vpop.eup %1380 }
 0x63a   :  { %v571_v57 = vmul.f32 %v1381_v55, %v569_v52  ;;  %vm576_vm3 = vweird.f32 %v1381_v55  ;;  %v1751_v52 = vld [vmem:[%s1935_s4] ss:$0 sm:$0xff] }
 0x63b   :  { %vm577_vm6 = vmor %vm575_vm4, %vm576_vm3 }
 0x63c   :  { %v572_v60 = vsub.f32 1.0, %v571_v57 }
 0x63e   :  { %v573_v63 = vmul.f32 %v1381_v55, %v572_v60 }
 0x640   :  { %v574_v3 = vadd.f32 %v1381_v55, %v573_v63 }
 0x642   :  { %v578_v9 = vsel %vm577_vm6, %v1381_v55, %v574_v3 }
 0x643   :  { %v583_v10 = vsel %vm580_vm7, %v582_v5, %v578_v9 }
 0x644   :  { %v1712_v11 = vmul.f32 %v1377_v47, %v583_v10 }
 0x645   :  { %v469_v12 = vpop.permute.xlu0 %468 }
 0x646   :  { %489 = vmatpush.msra.mxu2 %v469_v12  ;;  %1312 = vmatmul.msk.f32.vlgmr.msrb.gmra.mxu0 %vm111_vm1, %v1712_v11 }
 0x647   :  { %1322 = vmatpush.xpose.msk.msrb.mxu0 %vm111_vm1, %v842_v14  ;;  %1308 = vmatmul.msk.f32.vlgmr.msra.gmra.mxu2 %vm111_vm1, %v1714_v13 }
 0x648   :  { %1313 = vmatpush.xpose.msk.msrb.mxu2 %vm111_vm1, %v614_v59 }
 0x64c   :  { %1318 = vmatpush.xpose.msk.msra.mxu2 %vm111_vm1, %v739_v15 }
 0x64d   :  { %v612_v16 = vpop.permute.xlu0 %611 }
 0x64f   :  { %1314 = vmatmul.msk.f32.vlgmr.msrb.gmra.mxu2 %vm111_vm1, %v612_v16 }
 0x655   :  { %v737_v17 = vpop.permute.xlu0 %736 }
 0x657   :  { %1319 = vmatmul.msk.f32.vlgmr.msra.gmra.mxu2 %vm111_vm1, %v737_v17 }
 0x65d   :  { %v840_v22 = vpop.permute.xlu0 %839 }
 0x6c3   :  { %v608_v20 = vpop.f32.mrf.mxu0 }
 0x6c4   :  { %1317 = vmatmul.msk.f32.vlgmr.msra.gmra.mxu0 %vm111_vm1, %v608_v20 }
 0x6ca   :  { %v491_v21 = vpop.f32.mrf.mxu2 }
 0x6cb   :  { %1309 = vmatmul.msk.f32.vlgmr.msra.gmra.mxu1 %vm111_vm1, %v491_v21 }
 0x6cc   :  { %1323 = vmatmul.msk.f32.vlgmr.msrb.gmra.mxu0 %vm111_vm1, %v840_v22 }
 0x6d2   :  { %v636_v23 = vpop.f32.mrf.mxu2 }
 0x6d3   :  { %v639_v25 = vmul.f32 0.35355338, %v636_v23 }
 0x6d5   :  { %v640_v26 = vsel %vm111_vm1, %v639_v25, -inf }
 0x6d6   :  { %641 = vmax.xlane.f32.xlu1 %v640_v26 }
 0x6da   :  { %v761_v27 = vpop.f32.mrf.mxu2 }
 0x6db   :  { %v764_v29 = vmul.f32 0.35355338, %v761_v27  ;;  %v1510_v27 = vmov 32.0  }
 0x6dd   :  { %v765_v30 = vsel %vm111_vm1, %v764_v29, -inf }
 0x6de   :  { %766 = vmax.xlane.f32.xlu0 %v765_v30 }
 0x741   :  { %v1736_v31 = vpop.f32.mrf.mxu0 }
 0x748   :  { %v514_v49 = vpop.f32.mrf.mxu1 }
 0x749   :  { %v864_v32 = vpop.f32.mrf.mxu0  ;;  %v642_v34 = vpop.xlane.xlu1 %641  ;;  %v517_v51 = vadd.f32 %v514_v49, %v414_v50 }
 0x74a   :  { %v867_v36 = vmul.f32 0.35355338, %v864_v32  ;;  %v643_v37 = vsub.f32 %v639_v25, %v642_v34 }
 0x74b   :  { %v960_v53 = vadd.f32 %v1751_v52, %v517_v51 }
 0x74c   :  { %v644_v38 = vmul.f32 1.442695, %v643_v37  ;;  %v868_v39 = vsel %vm111_vm1, %v867_v36, -inf }
 0x74d   :  { %869 = vmax.xlane.f32.xlu2 %v868_v39  ;;  %v1755_v54 = vadd.f32 %v960_v53, %v1609_v4 }
 0x74e   :  { %1382 = vpow2.f32 %v644_v38 }
 0x74f   :  { %v966_v55 = vsel %vm74_vm0, %v1755_v54, 0.0 }
 0x751   :  { %v767_v40 = vpop.xlane.xlu0 %766 }
 0x752   :  { %v768_v41 = vsub.f32 %v764_v29, %v767_v40 }
 0x754   :  { %v1383_v42 = vpop.eup %1382  ;;  %v769_v43 = vmul.f32 1.442695, %v768_v41 }
 0x755   :  { %v646_v45 = vsel %vm111_vm1, %v1383_v42, 0.0 }
 0x756   :  { %1384 = vpow2.f32 %v769_v43  ;;  %647 = vadd.xlane.f32.xlu1 %v646_v45 }
 0x75c   :  { %v1385_v46 = vpop.eup %1384 }
 0x75d   :  { %v771_v47 = vsel %vm111_vm1, %v1385_v46, 0.0 }
 0x75e   :  { %772 = vadd.xlane.f32.xlu0 %v771_v47 }
 0x765   :  { %664 = vrot.lane.b32.xlu2 %v1636_v19, %s1505_s17 }
 0x772   :  { %789 = vrot.lane.b32.xlu0 %v1636_v19, %s1507_s26 }
 0x79c   :  { %967 = vadd.xlane.f32.xlu0 %v966_v55 }
 0x7c0   :  { %v870_v57 = vpop.xlane.xlu2 %869 }
 0x7c1   :  { %v871_v28 = vsub.f32 %v867_v36, %v870_v57 }
 0x7c3   :  { %v872_v33 = vmul.f32 1.442695, %v871_v28 }
 0x7c5   :  { %1386 = vpow2.f32 %v872_v33  ;;  %v1511_v33 = vmov 31.0  }
 0x7c8   :  { %v665_v35 = vpop.permute.xlu2 %664 }
 0x7c9   :  { %v648_v7 = vpop.xlane.xlu1 %647  ;;  %685 = vmatpush.msrb.mxu1 %v665_v35 }
 0x7ca   :  { %1388 = vrcp.f32 %v648_v7  ;;  %v660_v63 = vand.u32 2147483648, %v648_v7  ;;  %v658_v1 = vand.u32 2147483647, %v648_v7  ;;  %vm654_vm9 = vweird.f32 %v648_v7 }
 0x7cb   :  { %v1759_v58 = vpop.eup %1386 }
 0x7cc   :  { %v874_v59 = vsel %vm111_vm1, %v1759_v58, 0.0  ;;  %v661_v5 = vor.u32 1.1754944e-38, %v660_v63  ;;  %vm659_vm11 = vcmp.eq.f32.partialorder %v658_v1, 8.507059e+37 }
 0x7cd   :  { %875 = vadd.xlane.f32.xlu1 %v874_v59 }
 0x7d0   :  { %v1389_v4 = vpop.eup %1388 }
 0x7d1   :  { %v650_v60 = vmul.f32 %v1389_v4, %v648_v7  ;;  %v773_v61 = vpop.xlane.xlu0 %772  ;;  %vm655_vm8 = vweird.f32 %v1389_v4 }
 0x7d2   :  { %1390 = vrcp.f32 %v773_v61  ;;  %vm656_vm10 = vmor %vm654_vm9, %vm655_vm8  ;;  %v785_v15 = vand.u32 2147483648, %v773_v61  ;;  %v783_v17 = vand.u32 2147483647, %v773_v61  ;;  %vm779_vm13 = vweird.f32 %v773_v61 }
 0x7d3   :  { %v651_v62 = vsub.f32 1.0, %v650_v60  ;;  %1392 = vrcp.f32 %v1510_v27 }
 0x7d4   :  { %v786_v21 = vor.u32 1.1754944e-38, %v785_v15  ;;  %vm784_vm15 = vcmp.eq.f32.partialorder %v783_v17, 8.507059e+37 }
 0x7d5   :  { %v652_v0 = vmul.f32 %v1389_v4, %v651_v62  ;;  %v1067_v62 = vld [vmem:[%s1936_s5 + $0x8] sm:$0xff] }
 0x7d7   :  { %v653_v2 = vadd.f32 %v1389_v4, %v652_v0  ;;  %v1066_v0 = vld [vmem:[%s1936_s5] sm:$0xff] }
 0x7d8   :  { %v1391_v3 = vpop.eup %1390 }
 0x7d9   :  { %v657_v6 = vsel %vm656_vm10, %v1389_v4, %v653_v2  ;;  %v775_v9 = vmul.f32 %v1391_v3, %v773_v61  ;;  %vm780_vm12 = vweird.f32 %v1391_v3  ;;  %v1393_v29 = vpop.eup %1392  ;;  %v1068_v61 = vld [vmem:[%s1936_s5 + $0x10] sm:$0xff] }
 0x7da   :  { %v662_v10 = vsel %vm659_vm11, %v661_v5, %v657_v6  ;;  %vm781_vm14 = vmor %vm779_vm13, %vm780_vm12  ;;  %v973_v30 = vmul.f32 32.0, %v1393_v29  ;;  %vm977_vm2 = vweird.f32 %v1393_v29 }
 0x7db   :  { %v776_v12 = vsub.f32 1.0, %v775_v9  ;;  %v1763_v14 = vmul.f32 %v1383_v42, %v662_v10 }
 0x7dc   :  { %v974_v32 = vsub.f32 1.0, %v973_v30 }
 0x7dd   :  { %v777_v16 = vmul.f32 %v1391_v3, %v776_v12  ;;  %1315 = vmatmul.msk.f32.vlgmr.msrb.gmra.mxu1 %vm111_vm1, %v1763_v14 }
 0x7de   :  { %v975_v34 = vmul.f32 %v1393_v29, %v974_v32 }
 0x7df   :  { %v778_v20 = vadd.f32 %v1391_v3, %v777_v16 }
 0x7e0   :  { %v976_v36 = vadd.f32 %v1393_v29, %v975_v34 }
 0x7e1   :  { %v782_v22 = vsel %vm781_vm14, %v1391_v3, %v778_v20  ;;  %vm1133_vm14 = vcmask 523264  }
 0x7e2   :  { %v787_v23 = vsel %vm784_vm15, %v786_v21, %v782_v22  ;;  %v1774_v37 = vsel %vm977_vm2, %v1393_v29, %v976_v36  ;;  %v1808_v29 = vld [vmem:[%s1940_s9] ss:$0 sm:$0xff] }
 0x7e3   :  { %v1767_v25 = vmul.f32 %v1385_v46, %v787_v23 }
 0x7e4   :  { %v790_v26 = vpop.permute.xlu0 %789 }
 0x7e5   :  { %810 = vmatpush.msra.mxu1 %v790_v26 }
 0x7e6   :  { %892 = vrot.lane.b32.xlu1 %v1636_v19, %s1509_s28  ;;  %1320 = vmatmul.msk.f32.vlgmr.msra.gmra.mxu1 %vm111_vm1, %v1767_v25 }
 0x7e7   :  { %936 = vmatpush.msrb.mxu1 %v1728_v18 }
 0x80f   :  { %v968_v38 = vpop.xlane.xlu0 %967 }
 0x810   :  { %v979_v39 = vmul.f32 %v1774_v37, %v968_v38 }
 0x812   :  { %v1778_v19 = vsub.f32 %v1755_v54, %v979_v39 }
 0x814   :  { %v983_v40 = vmul.f32 %v1778_v19, %v1778_v19  ;;  %v1057_v38 = vmul.f32 %v1808_v29, %v1778_v19  ;;  %v1128_v19 = vld [vmem:[%s1938_s7 + $0x38] sm:$0xff] }
 0x815   :  { %1148 = vmatpush.msra.mxu0 %v1128_v19 }
 0x816   :  { %v985_v18 = vsel %vm74_vm0, %v983_v40, 0.0  ;;  %v1815_v40 = vld [vmem:[%s1941_s10] ss:$0 sm:$0xff]  ;;  %s1259_s10 = sshll.u32 %s1515_s14, 4  ;;  %s1260_s10 = int_to_ptr.vmem [resolvable:$true] %s1259_s10 }
 0x817   :  { %986 = vadd.xlane.f32.xlu1 %v985_v18 }
 0x840   :  { %v876_v41 = vpop.xlane.xlu1 %875 }
 0x841   :  { %1394 = vrcp.f32 %v876_v41  ;;  %v888_v48 = vand.u32 2147483648, %v876_v41  ;;  %vm882_vm4 = vweird.f32 %v876_v41  ;;  %v886_v49 = vand.u32 2147483647, %v876_v41 }
 0x842   :  { %1396 = vrcp.f32 %v1511_v33 }
 0x843   :  { %v889_v51 = vor.u32 1.1754944e-38, %v888_v48  ;;  %vm887_vm6 = vcmp.eq.f32.partialorder %v886_v49, 8.507059e+37  ;;  %v1124_v49 = vld [vmem:[%s1938_s7 + $0x18] sm:$0xff] }
 0x847   :  { %v1395_v42 = vpop.eup %1394 }
 0x848   :  { %v878_v43 = vmul.f32 %v1395_v42, %v876_v41  ;;  %vm883_vm3 = vweird.f32 %v1395_v42  ;;  %v1397_v35 = vpop.eup %1396 }
 0x849   :  { %vm884_vm5 = vmor %vm882_vm4, %vm883_vm3  ;;  %v992_v7 = vmul.f32 31.0, %v1397_v35  ;;  %vm996_vm7 = vweird.f32 %v1397_v35 }
 0x84a   :  { %v879_v45 = vsub.f32 1.0, %v878_v43 }
 0x84b   :  { %v993_v59 = vsub.f32 1.0, %v992_v7 }
 0x84c   :  { %v880_v46 = vmul.f32 %v1395_v42, %v879_v45  ;;  %v1127_v45 = vld [vmem:[%s1938_s7 + $0x30] sm:$0xff] }
 0x84d   :  { %v994_v4 = vmul.f32 %v1397_v35, %v993_v59  ;;  %1149 = vmatpush.msra.mxu0 %v1127_v45 }
 0x84e   :  { %v881_v47 = vadd.f32 %v1395_v42, %v880_v46  ;;  %v1126_v46 = vld [vmem:[%s1938_s7 + $0x28] sm:$0xff] }
 0x84f   :  { %v995_v60 = vadd.f32 %v1397_v35, %v994_v4  ;;  %1150 = vmatpush.msra.mxu0 %v1126_v46 }
 0x850   :  { %v885_v50 = vsel %vm884_vm5, %v1395_v42, %v881_v47  ;;  %v1125_v47 = vld [vmem:[%s1938_s7 + $0x20] sm:$0xff] }
 0x851   :  { %v890_v53 = vsel %vm887_vm6, %v889_v51, %v885_v50  ;;  %v1799_v63 = vsel %vm996_vm7, %v1397_v35, %v995_v60  ;;  %1151 = vmatpush.msra.mxu0 %v1125_v47  ;;  %v1123_v50 = vld [vmem:[%s1938_s7 + $0x10] sm:$0xff]  ;;  %v1122_v51 = vld [vmem:[%s1938_s7 + $0x8] sm:$0xff] }
 0x852   :  { %v1784_v55 = vmul.f32 %v1759_v58, %v890_v53  ;;  %v1069_v58 = vld [vmem:[%s1936_s5 + $0x18] sm:$0xff]  ;;  %v1121_v53 = vld [vmem:[%s1938_s7] sm:$0xff] }
 0x853   :  { %1152 = vmatpush.msra.mxu0 %v1124_v49 }
 0x855   :  { %1153 = vmatpush.msra.mxu0 %v1123_v50 }
 0x857   :  { %1154 = vmatpush.msra.mxu0 %v1122_v51 }
 0x858   :  { %v893_v54 = vpop.permute.xlu1 %892 }
 0x859   :  { %913 = vmatpush.msrb.mxu2 %v893_v54  ;;  %1155 = vmatpush.msra.mxu0 %v1121_v53 }
 0x85a   :  { %v687_v57 = vpop.f32.mrf.mxu1  ;;  %1324 = vmatmul.msk.f32.vlgmr.msrb.gmra.mxu2 %vm111_vm1, %v1784_v55 }
 0x85b   :  { %1316 = vmatmul.msk.f32.vlgmr.msra.gmra.mxu3 %vm111_vm1, %v687_v57  ;;  %v1847_v57 = vld [vmem:[%s1937_s6] ss:$0 sm:$0xff] }
 0x85c   :  { %1092 = vmatpush.msra.mxu3 %v1069_v58 }
 0x85e   :  { %1093 = vmatpush.msra.mxu3 %v1068_v61 }
 0x860   :  { %1094 = vmatpush.msra.mxu3 %v1067_v62 }
 0x862   :  { %1095 = vmatpush.msra.mxu3 %v1066_v0 }
 0x863   :  { %v812_v28 = vpop.f32.mrf.mxu1 }
 0x864   :  { %1321 = vmatmul.msk.f32.vlgmr.msrb.gmra.mxu3 %vm111_vm1, %v812_v28 }
 0x88a   :  { %v987_v1 = vpop.xlane.xlu1 %986 }
 0x88b   :  { %v998_v2 = vmul.f32 %v1799_v63, %v987_v1 }
 0x88d   :  { %1398 = vrsqrt.f32 %v998_v2  ;;  %vm1007_vm8 = vcmp.eq.f32.partialorder %v998_v2, inf  ;;  %v1010_v16 = vand.u32 2147483648, %v998_v2  ;;  %vm1009_vm9 = vcmp.eq.f32.partialorder %v998_v2, 0.0 }
 0x893   :  { %v1399_v3 = vpop.eup %1398 }
 0x894   :  { %v1001_v5 = vmul.f32 %v1399_v3, %v998_v2 }
 0x896   :  { %v1002_v6 = vmul.f32 %v1399_v3, %v1001_v5 }
 0x898   :  { %v1003_v9 = vmul.f32 0.5, %v1002_v6 }
 0x89a   :  { %v1004_v10 = vsub.f32 1.5, %v1003_v9 }
 0x89c   :  { %v1005_v12 = vmul.f32 %v1399_v3, %v1004_v10 }
 0x89e   :  { %v1006_v15 = vmul.f32 %v1005_v12, %v998_v2  ;;  %v1858_v12 = vld [vmem:[%s1939_s8] ss:$0 sm:$0xff]  ;;  %s1512_s8 = smov 16  }
 0x8a0   :  { %v1008_v17 = vsel %vm1007_vm8, %v998_v2, %v1006_v15 }
 0x8a1   :  { %v1011_v20 = vsel %vm1009_vm9, %v1010_v16, %v1008_v17 }
 0x8a2   :  { %v1024_v21 = vadd.f32 1e-06, %v1011_v20 }
 0x8a4   :  { %1400 = vrcp.f32 %v1024_v21  ;;  %v1037_v27 = vand.u32 2147483648, %v1024_v21  ;;  %v1035_v32 = vand.u32 2147483647, %v1024_v21  ;;  %vm1031_vm11 = vweird.f32 %v1024_v21 }
 0x8a6   :  { %v1038_v36 = vor.u32 1.1754944e-38, %v1037_v27  ;;  %vm1036_vm13 = vcmp.eq.f32.partialorder %v1035_v32, 8.507059e+37 }
 0x8aa   :  { %v1401_v22 = vpop.eup %1400 }
 0x8ab   :  { %v1027_v23 = vmul.f32 %v1401_v22, %v1024_v21  ;;  %vm1032_vm10 = vweird.f32 %v1401_v22 }
 0x8ac   :  { %vm1033_vm12 = vmor %vm1031_vm11, %vm1032_vm10 }
 0x8ad   :  { %v1028_v26 = vsub.f32 1.0, %v1027_v23 }
 0x8af   :  { %v1029_v30 = vmul.f32 %v1401_v22, %v1028_v26 }
 0x8b1   :  { %v1030_v34 = vadd.f32 %v1401_v22, %v1029_v30 }
 0x8b3   :  { %v1034_v39 = vsel %vm1033_vm12, %v1401_v22, %v1030_v34 }
 0x8b4   :  { %v1039_v18 = vsel %vm1036_vm13, %v1038_v36, %v1034_v39  ;;  %vm528_vm13 = vcmask 130048  }
 0x8b5   :  { %v1059_v41 = vmul.f32 %v1057_v38, %v1039_v18 }
 0x8b7   :  { %v1064_v42 = vadd.f32 %v1815_v40, %v1059_v41 }
 0x8b9   :  { %1326 = vmatmul.msk.f32.vlgmr.msra.gmra.mxu3 %vm74_vm0, %v1064_v42 }
 0x8dd   :  { %v915_v43 = vpop.f32.mrf.mxu2 }
 0x8de   :  { %1325 = vmatmul.msk.f32.vlgmr.msrb.gmra.mxu1 %vm111_vm1, %v915_v43  ;;  %v710_v48 = vpop.f32.mrf.mxu3 }
 0x8df   :  { %v734_v1 = vadd.f32 %v1736_v31, %v710_v48 }
 0x8e7   :  { %v835_v54 = vpop.f32.mrf.mxu3 }
 0x8e8   :  { %v838_v2 = vadd.f32 %v835_v54, %v734_v1 }
 0x93c   :  { %v1097_v28 = vpop.f32.mrf.mxu3 }
 0x93d   :  { %v1098_v33 = vadd.f32 %v1847_v57, %v1097_v28 }
 0x93f   :  { %v1105_v35 = vmul.f32 0.044715, %v1098_v33  ;;  %v1103_v61 = vmul.f32 0.5, %v1098_v33 }
 0x941   :  { %v1107_v7 = vmul.f32 %v1105_v35, %v1098_v33 }
 0x943   :  { %v1109_v59 = vmul.f32 %v1107_v7, %v1098_v33 }
 0x945   :  { %v1111_v4 = vadd.f32 %v1109_v59, %v1098_v33 }
 0x947   :  { %v1113_v60 = vmul.f32 0.7978846, %v1111_v4 }
 0x949   :  { %1402 = vtanh.f32 %v1113_v60 }
 0x94f   :  { %v1403_v58 = vpop.eup %1402 }
 0x950   :  { %v1117_v62 = vadd.f32 1.0, %v1403_v58 }
 0x952   :  { %v1119_v0 = vmul.f32 %v1117_v62, %v1103_v61 }
 0x954   :  { %1328 = vmatmul.msk.f32.vlgmr.msra.gmra.mxu0 %vm1133_vm14, %v1119_v0 }
 0x95b   :  { %v938_v3 = vpop.f32.mrf.mxu1 }
 0x95c   :  { %v941_v5 = vadd.f32 %v938_v3, %v838_v2 }
 0x95e   :  { %v961_v6 = vadd.f32 %v1751_v52, %v941_v5 }
 0x960   :  { %v963_v9 = vadd.f32 %v961_v6, %v1623_v8 }
 0x962   :  { %v969_v10 = vsel %vm74_vm0, %v963_v9, 0.0 }
 0x963   :  { %970 = vadd.xlane.f32.xlu2 %v969_v10 }
 0x9d1   :  { %v1157_v15 = vpop.f32.mrf.mxu0 }
 0x9d2   :  { %v1158_v16 = vadd.f32 %v1858_v12, %v1157_v15 }
 0x9d4   :  { %v1163_v17 = vadd.f32 %v1158_v16, %v1064_v42 }
 0x9d6   :  { %v971_v31 = vpop.xlane.xlu2 %970  ;;  %v1167_v20 = vsel %vm74_vm0, %v1163_v17, 0.0 }
 0x9d7   :  { %v980_v21 = vmul.f32 %v1774_v37, %v971_v31  ;;  %1168 = vadd.xlane.f32.xlu2 %v1167_v20  ;;  %v1882_v31 = vld [vmem:[%s1942_s11] ss:$0 sm:$0xff]  ;;  %s1513_s11 = smov 24  }
 0x9d9   :  { %v982_v52 = vsub.f32 %v963_v9, %v980_v21 }
 0x9db   :  { %v984_v8 = vmul.f32 %v982_v52, %v982_v52 }
 0x9dd   :  { %v988_v22 = vsel %vm74_vm0, %v984_v8, 0.0 }
 0x9de   :  { %989 = vadd.xlane.f32.xlu0 %v988_v22 }
 0xa4a   :  { %v1169_v23 = vpop.xlane.xlu2 %1168 }
 0xa4b   :  { %v1173_v26 = vmul.f32 %v1169_v23, %v1774_v37 }
 0xa4d   :  { %v1865_v27 = vsub.f32 %v1163_v17, %v1173_v26  ;;  %v1889_v26 = vld [vmem:[%s1943_s12] ss:$0 sm:$0xff]  ;;  %s1514_s12 = smov [#allocation6]  }
 0xa4e   :  { %s1272_s9 = sshll.u32 %s1514_s12, 4  ;;  %s1273_s9 = int_to_ptr.vmem [resolvable:$true] %s1272_s9 }
 0xa4f   :  { %v1177_v30 = vmul.f32 %v1865_v27, %v1865_v27  ;;  %v1244_v22 = vmul.f32 %v1882_v31, %v1865_v27 }
 0xa51   :  { %v990_v32 = vpop.xlane.xlu0 %989  ;;  %v1179_v34 = vsel %vm74_vm0, %v1177_v30, 0.0 }
 0xa52   :  { %v999_v36 = vmul.f32 %v1799_v63, %v990_v32  ;;  %1180 = vadd.xlane.f32.xlu0 %v1179_v34 }
 0xa54   :  { %1404 = vrsqrt.f32 %v999_v36  ;;  %vm1019_vm15 = vcmp.eq.f32.partialorder %v999_v36, inf  ;;  %v1022_v45 = vand.u32 2147483648, %v999_v36  ;;  %vm1021_vm2 = vcmp.eq.f32.partialorder %v999_v36, 0.0 }
 0xa5a   :  { %v1405_v38 = vpop.eup %1404 }
 0xa5b   :  { %v1013_v39 = vmul.f32 %v1405_v38, %v999_v36 }
 0xa5d   :  { %v1014_v18 = vmul.f32 %v1405_v38, %v1013_v39 }
 0xa5f   :  { %v1015_v41 = vmul.f32 0.5, %v1014_v18 }
 0xa61   :  { %v1016_v42 = vsub.f32 1.5, %v1015_v41 }
 0xa63   :  { %v1017_v43 = vmul.f32 %v1405_v38, %v1016_v42 }
 0xa65   :  { %v1018_v19 = vmul.f32 %v1017_v43, %v999_v36 }
 0xa66   :  { %521 = vrot.lane.b32.xlu0 %v1679_v24, %s1512_s8  ;;  %v1058_v24 = vmul.f32 %v1808_v29, %v982_v52 }
 0xa67   :  { %v1020_v46 = vsel %vm1019_vm15, %v999_v36, %v1018_v19 }
 0xa68   :  { %v1023_v47 = vsel %vm1021_vm2, %v1022_v45, %v1020_v46 }
 0xa69   :  { %v1025_v48 = vadd.f32 1e-06, %v1023_v47 }
 0xa6b   :  { %1406 = vrcp.f32 %v1025_v48  ;;  %v1051_v53 = vand.u32 2147483648, %v1025_v48  ;;  %v1049_v28 = vand.u32 2147483647, %v1025_v48  ;;  %vm1045_vm4 = vweird.f32 %v1025_v48 }
 0xa6d   :  { %v1052_v35 = vor.u32 1.1754944e-38, %v1051_v53  ;;  %vm1050_vm6 = vcmp.eq.f32.partialorder %v1049_v28, 8.507059e+37 }
 0xa6e   :  { %942 = vrot.lane.b32.xlu0 %v1763_v14, %s1498_s19 }
 0xa71   :  { %v1407_v49 = vpop.eup %1406 }
 0xa72   :  { %v1041_v50 = vmul.f32 %v1407_v49, %v1025_v48  ;;  %vm1046_vm3 = vweird.f32 %v1407_v49 }
 0xa73   :  { %vm1047_vm5 = vmor %vm1045_vm4, %vm1046_vm3 }
 0xa74   :  { %v1042_v51 = vsub.f32 1.0, %v1041_v50 }
 0xa76   :  { %v1043_v54 = vmul.f32 %v1407_v49, %v1042_v51 }
 0xa78   :  { %v1044_v33 = vadd.f32 %v1407_v49, %v1043_v54 }
 0xa7a   :  { %v1048_v7 = vsel %vm1047_vm5, %v1407_v49, %v1044_v33 }
 0xa7b   :  { %v1053_v59 = vsel %vm1050_vm6, %v1052_v35, %v1048_v7 }
 0xa7c   :  { %v1060_v4 = vmul.f32 %v1058_v24, %v1053_v59 }
 0xa7e   :  { %v1065_v60 = vadd.f32 %v1815_v40, %v1060_v4 }
 0xa80   :  { %1327 = vmatmul.msk.f32.gmra.mxu3 %vm74_vm0, %v1065_v60 }
 0xac5   :  { %v1181_v14 = vpop.xlane.xlu0 %1180 }
 0xac6   :  { %v1185_v58 = vmul.f32 %v1181_v14, %v1799_v63 }
 0xac8   :  { %1408 = vrsqrt.f32 %v1185_v58  ;;  %vm1194_vm7 = vcmp.eq.f32.partialorder %v1185_v58, inf  ;;  %v1197_v29 = vand.u32 2147483648, %v1185_v58  ;;  %vm1196_vm8 = vcmp.eq.f32.partialorder %v1185_v58, 0.0 }
 0xace   :  { %v1409_v61 = vpop.eup %1408 }
 0xacf   :  { %v1188_v62 = vmul.f32 %v1409_v61, %v1185_v58 }
 0xad1   :  { %v1189_v0 = vmul.f32 %v1409_v61, %v1188_v62 }
 0xad3   :  { %v1190_v1 = vmul.f32 0.5, %v1189_v0 }
 0xad5   :  { %v1191_v2 = vsub.f32 1.5, %v1190_v1 }
 0xad7   :  { %v1192_v3 = vmul.f32 %v1409_v61, %v1191_v2 }
 0xad9   :  { %v1193_v5 = vmul.f32 %v1192_v3, %v1185_v58 }
 0xadb   :  { %v1195_v6 = vsel %vm1194_vm7, %v1185_v58, %v1193_v5 }
 0xadc   :  { %v1198_v9 = vsel %vm1196_vm8, %v1197_v29, %v1195_v6 }
 0xadd   :  { %v1211_v10 = vadd.f32 1e-06, %v1198_v9 }
 0xadf   :  { %1410 = vrcp.f32 %v1211_v10  ;;  %v1224_v17 = vand.u32 2147483648, %v1211_v10  ;;  %v1222_v21 = vand.u32 2147483647, %v1211_v10  ;;  %vm1218_vm10 = vweird.f32 %v1211_v10 }
 0xae1   :  { %v1225_v8 = vor.u32 1.1754944e-38, %v1224_v17  ;;  %vm1223_vm12 = vcmp.eq.f32.partialorder %v1222_v21, 8.507059e+37 }
 0xae5   :  { %v1411_v40 = vpop.eup %1410 }
 0xae6   :  { %v1214_v15 = vmul.f32 %v1411_v40, %v1211_v10  ;;  %vm1219_vm9 = vweird.f32 %v1411_v40 }
 0xae7   :  { %vm1220_vm11 = vmor %vm1218_vm10, %vm1219_vm9 }
 0xae8   :  { %v1215_v16 = vsub.f32 1.0, %v1214_v15 }
 0xaea   :  { %v1216_v20 = vmul.f32 %v1411_v40, %v1215_v16 }
 0xaec   :  { %v1217_v52 = vadd.f32 %v1411_v40, %v1216_v20 }
 0xaee   :  { %v1221_v23 = vsel %vm1220_vm11, %v1411_v40, %v1217_v52 }
 0xaef   :  { %v1226_v30 = vsel %vm1223_vm12, %v1225_v8, %v1221_v23 }
 0xaf0   :  { %v1246_v32 = vmul.f32 %v1244_v22, %v1226_v30 }
 0xaf2   :  { %v1251_v34 = vadd.f32 %v1889_v26, %v1246_v32 }
 0xaf4   :  { %1253 = vst.msk [vmem:[#allocation5] sm:$0xff] %vm74_vm0, %v1251_v34 }
 0xb03   :  { %v1100_v36 = vpop.f32.mrf.mxu3 }
 0xb04   :  { %v1101_v38 = vadd.f32 %v1847_v57, %v1100_v36 }
 0xb06   :  { %v1106_v39 = vmul.f32 0.044715, %v1101_v38  ;;  %v1104_v19 = vmul.f32 0.5, %v1101_v38 }
 0xb08   :  { %v1108_v18 = vmul.f32 %v1106_v39, %v1101_v38 }
 0xb0a   :  { %v1110_v41 = vmul.f32 %v1108_v18, %v1101_v38 }
 0xb0c   :  { %v1112_v27 = vadd.f32 %v1110_v41, %v1101_v38 }
 0xb0e   :  { %v1114_v42 = vmul.f32 0.7978846, %v1112_v27 }
 0xb10   :  { %1412 = vtanh.f32 %v1114_v42 }
 0xb16   :  { %v1413_v43 = vpop.eup %1412 }
 0xb17   :  { %v1118_v45 = vadd.f32 1.0, %v1413_v43 }
 0xb19   :  { %v1120_v46 = vmul.f32 %v1118_v45, %v1104_v19 }
 0xb1b   :  { %1329 = vmatmul.msk.f32.gmra.mxu0 %vm1133_vm14, %v1120_v46  ;;  %vm530_vm14 = vcmask 195584  }
 0xb98   :  { %v1160_v47 = vpop.f32.mrf.mxu0 }
 0xb99   :  { %v1161_v48 = vadd.f32 %v1858_v12, %v1160_v47 }
 0xb9b   :  { %v1164_v49 = vadd.f32 %v1161_v48, %v1065_v60 }
 0xb9d   :  { %v1170_v50 = vsel %vm74_vm0, %v1164_v49, 0.0 }
 0xb9e   :  { %1171 = vadd.xlane.f32.xlu1 %v1170_v50 }
 0xbb7   :  { %518 = vrot.lane.b32.xlu1 %v1654_v56, %s1498_s19  ;;  %v522_v56 = vpop.permute.xlu0 %521 }
 0xbbf   :  { %945 = vrot.lane.b32.xlu1 %v1767_v25, %s1512_s8 }
 0xc11   :  { %v1172_v57 = vpop.xlane.xlu1 %1171 }
 0xc12   :  { %v1174_v51 = vmul.f32 %v1172_v57, %v1774_v37 }
 0xc14   :  { %v1176_v53 = vsub.f32 %v1164_v49, %v1174_v51 }
 0xc16   :  { %v1178_v54 = vmul.f32 %v1176_v53, %v1176_v53  ;;  %v1245_v20 = vmul.f32 %v1882_v31, %v1176_v53 }
 0xc18   :  { %v1182_v28 = vsel %vm74_vm0, %v1178_v54, 0.0 }
 0xc19   :  { %1183 = vadd.xlane.f32.xlu2 %v1182_v28 }
 0xc29   :  { %v519_v35 = vpop.permute.xlu1 %518 }
 0xc2a   :  { %v527_v25 = vsel %vm111_vm1, %v1649_v44, %v519_v35 }
 0xc2b   :  { %v529_v37 = vsel %vm528_vm13, %v527_v25, %v522_v56 }
 0xc31   :  { %524 = vrot.lane.b32.xlu2 %v1714_v13, %s1513_s11 }
 0xc39   :  { %948 = vrot.lane.b32.xlu2 %v1784_v55, %s1513_s11  ;;  %v943_v55 = vpop.permute.xlu0 %942 }
 0xc3a   :  { %v951_v60 = vsel %vm111_vm1, %v1712_v11, %v943_v55 }
 0xc8c   :  { %v1184_v12 = vpop.xlane.xlu2 %1183 }
 0xc8d   :  { %v1186_v33 = vmul.f32 %v1184_v12, %v1799_v63  ;;  %v946_v63 = vpop.permute.xlu1 %945 }
 0xc8e   :  { %v952_v14 = vsel %vm528_vm13, %v951_v60, %v946_v63 }
 0xc8f   :  { %1414 = vrsqrt.f32 %v1186_v33  ;;  %vm1206_vm15 = vcmp.eq.f32.partialorder %v1186_v33, inf  ;;  %v1209_v2 = vand.u32 2147483648, %v1186_v33  ;;  %vm1208_vm1 = vcmp.eq.f32.partialorder %v1186_v33, 0.0 }
 0xc94   :  { %v525_v24 = vpop.permute.xlu2 %524 }
 0xc95   :  { %v1415_v7 = vpop.eup %1414  ;;  %v531_v59 = vsel %vm530_vm14, %v529_v37, %v525_v24 }
 0xc96   :  { %v1200_v13 = vmul.f32 %v1415_v7, %v1186_v33  ;;  %532 = vst.msk [vmem:[#allocation6] sm:$0xff] %vm74_vm0, %v531_v59 }
 0xc98   :  { %v1201_v4 = vmul.f32 %v1415_v7, %v1200_v13 }
 0xc9a   :  { %v1202_v44 = vmul.f32 0.5, %v1201_v4 }
 0xc9c   :  { %v1203_v58 = vsub.f32 1.5, %v1202_v44  ;;  %v949_v61 = vpop.permute.xlu2 %948 }
 0xc9d   :  { %v953_v62 = vsel %vm530_vm14, %v952_v14, %v949_v61 }
 0xc9e   :  { %v1204_v0 = vmul.f32 %v1415_v7, %v1203_v58  ;;  %955 = vst.msk [vmem:[#allocation6 + $0x8] sm:$0xff] %vm74_vm0, %v953_v62 }
 0xc9f   :  { %1280 = dma.vmem_to_hbm [thread:$0]  %s1273_s9, 256, %s1275_s27, [#allocation7], %s1497_s18, %s1497_s18, %s1498_s19  }
 0xca0   :  { %v1205_v1 = vmul.f32 %v1204_v0, %v1186_v33 }
 0xca2   :  { %v1207_v3 = vsel %vm1206_vm15, %v1186_v33, %v1205_v1 }
 0xca3   :  { %v1210_v11 = vsel %vm1208_vm1, %v1209_v2, %v1207_v3 }
 0xca4   :  { %v1212_v5 = vadd.f32 1e-06, %v1210_v11 }
 0xca6   :  { %1416 = vrcp.f32 %v1212_v5  ;;  %v1238_v10 = vand.u32 2147483648, %v1212_v5  ;;  %v1236_v15 = vand.u32 2147483647, %v1212_v5  ;;  %vm1232_vm3 = vweird.f32 %v1212_v5 }
 0xca8   :  { %v1239_v17 = vor.u32 1.1754944e-38, %v1238_v10  ;;  %vm1237_vm5 = vcmp.eq.f32.partialorder %v1236_v15, 8.507059e+37 }
 0xcac   :  { %v1417_v29 = vpop.eup %1416 }
 0xcad   :  { %v1228_v6 = vmul.f32 %v1417_v29, %v1212_v5  ;;  %vm1233_vm2 = vweird.f32 %v1417_v29 }
 0xcae   :  { %vm1234_vm4 = vmor %vm1232_vm3, %vm1233_vm2 }
 0xcaf   :  { %v1229_v9 = vsub.f32 1.0, %v1228_v6 }
 0xcb1   :  { %v1230_v40 = vmul.f32 %v1417_v29, %v1229_v9 }
 0xcb3   :  { %v1231_v16 = vadd.f32 %v1417_v29, %v1230_v40 }
 0xcb5   :  { %v1235_v21 = vsel %vm1234_vm4, %v1417_v29, %v1231_v16 }
 0xcb6   :  { %v1240_v52 = vsel %vm1237_vm5, %v1239_v17, %v1235_v21 }
 0xcb7   :  { %v1247_v8 = vmul.f32 %v1245_v20, %v1240_v52 }
 0xcb9   :  { %v1252_v22 = vadd.f32 %v1889_v26, %v1247_v8 }
 0xcbb   :  { %1254 = vst.msk [vmem:[#allocation5 + $0x8] sm:$0xff] %vm74_vm0, %v1252_v22 }
 0xcbc   :  { %1267 = dma.vmem_to_hbm [thread:$0]  %s1260_s10, 256, %s1262_s1, [#allocation4], %s1497_s18, %s1497_s18, %s1498_s19  }
 0xcbd   :  { %1492 = dma.done.wait [#allocation4], 256  }
 0xcbe   :  { %1493 = vsyncadd [#allocation4], 4294967040 }
 0xcbf   :  { %1494 = dma.done.wait [#allocation7], 256  }
 0xcc0   :  { %1495 = vsyncadd [#allocation7], 4294967040 }
 0xcc1   :  { %1289 = vsyncpa [#allocation3], 1 }
 0xcc2   :  { %1290 = vsyncpa [#allocation4], 1 }
 0xcc3   :  { %1291 = vsyncpa [#allocation7], 1 }

</bundles_post_ra>
